<compile_context>
chip_gen: v7x
topology: tpu7x:2x2x1
jax: 0.10.0
libtpu: 0.0.40
codegen_flags: <defaults>
</compile_context>

<pallas_src>
import jax
import jax.numpy as jnp
from jax.experimental import pallas as pl
from jax.experimental.pallas import tpu as pltpu

N, C_IN, H, W = 2, 1, 4, 4          # forward implies 4x4 spatial (view(-1, 4*4*50))
C1, C2 = 20, 50                     # conv channel counts
HW = H * W                          # 16 pixels per image
P = N * HW                          # 32 pixel rows, ordered p = hw*N + n
FC1_IN, FC1_OUT, FC2_OUT = HW * C2, 500, 10
BN_EPS = 1e-5


# ---------------------------------------------------------------------------
# Fused kernel.
#   x_ref    : (P, 1)          pixel rows (C_in = 1), row p = hw*N + n
#   slab_ref : (8, 512) f32    packed small params:
#                row 0: conv1_w[20] | row 1: conv1_b[20] | row 2: bn_gamma[20]
#                row 3: bn_beta[20] | row 4: conv2_b[50] | row 5: fc1_b[500]
#                row 6: fc2_b[10]   | row 7: zero pad
#   w2_ref   : (20, 50) f32    conv2 1x1 weight, (in, out)
#   fc1w_ref : (16, 50, 500)   bf16; fc1w_ref[hw, c, f] == fc1_w_pt[f, c*16 + hw]
#   fc2w_ref : (500, 10) f32
#   o_ref    : (N, 10) f32     log_softmax output
#   h2_scr   : (P, 50) f32     VMEM scratch for the conv2 activation
# ---------------------------------------------------------------------------
def fused_kernel(x_ref, slab_ref, w2_ref, fc1w_ref, fc2w_ref, o_ref, h2_scr):
    # -- conv1 (1x1, K=1, C_in=1): VPU broadcast multiply
    x = x_ref[...]                                    # (P, 1)
    w1 = slab_ref[0:1, 0:C1]                          # (1, C1)
    b1 = slab_ref[1:2, 0:C1]
    gamma = slab_ref[2:3, 0:C1]
    beta = slab_ref[3:4, 0:C1]
    h1 = x * w1 + b1                                  # (P, C1)

    # -- BatchNorm2d, training-mode batch stats over (N,H,W) == all pixel rows
    mean = jnp.mean(h1, axis=0, keepdims=True)        # (1, C1)
    d = h1 - mean
    var = jnp.mean(d * d, axis=0, keepdims=True)      # biased variance (PyTorch training fwd)
    h1 = jnp.maximum(d * jax.lax.rsqrt(var + BN_EPS) * gamma + beta, 0.0)   # BN + ReLU

    # -- conv2 (1x1): matmul over the channel axis, ReLU.  Store to scratch so the
    #    per-pixel rows can be sliced with plain static ref slices below.
    b2 = slab_ref[4:5, 0:C2]
    h2 = jnp.dot(h1, w2_ref[...], preferred_element_type=jnp.float32) + b2
    h2_scr[...] = jnp.maximum(h2, 0.0)                # (P, C2)

    # -- flatten + fc1 fused: the PyTorch channel-major flatten is folded into the
    #    (HW, C2, 500) weight layout; the contraction over 800 = 16*50 becomes 16
    #    per-pixel (N, C2) @ (C2, 500) matmuls accumulated in f32.  Rows for pixel hw
    #    are contiguous (p = hw*N + n) -> static contiguous slices only.
    fb1 = slab_ref[5:6, 0:FC1_OUT]
    h3 = jnp.zeros((N, FC1_OUT), jnp.float32)
    for hw in range(HW):                              # static unroll, 16 iters
        rows = h2_scr[hw * N:(hw + 1) * N, :]         # (N, C2)
        h3 = h3 + jnp.dot(rows.astype(jnp.bfloat16), fc1w_ref[hw],
                          preferred_element_type=jnp.float32)
    h3 = jnp.maximum(h3 + fb1, 0.0)                   # (N, 500)

    # -- fc2 -> log_softmax (stable)
    fb2 = slab_ref[6:7, 0:FC2_OUT]
    logits = jnp.dot(h3, fc2w_ref[...], preferred_element_type=jnp.float32) + fb2
    m = jnp.max(logits, axis=1, keepdims=True)
    lse = m + jnp.log(jnp.sum(jnp.exp(logits - m), axis=1, keepdims=True))
    o_ref[...] = logits - lse


_VMEM = pl.BlockSpec(memory_space=pltpu.MemorySpace.VMEM)


@jax.jit
def mock_model_forward(x, params):
    # x: (N, 1, 4, 4) NCHW f32.  Reorder to hw-major pixel rows (p = hw*N + n);
    # the (2,16) transpose is a trivial XLA op outside the kernel.
    x_pix = x.reshape(N, HW).T.reshape(P, C_IN)
    return pl.pallas_call(
        fused_kernel,
        out_shape=jax.ShapeDtypeStruct((N, FC2_OUT), jnp.float32),
        in_specs=[_VMEM] * 5,
        out_specs=_VMEM,
        scratch_shapes=[pltpu.VMEM((P, C2), jnp.float32)],
    )(x_pix, params["slab"], params["conv2_w"], params["fc1_w"], params["fc2_w"])


def init_params(key):
    """Deterministic init (uniform, PyTorch-style fan_in bounds).

    Returns (kernel_params, raw_params) — raw_params feed the pure-JAX reference.
    """
    ks = jax.random.split(key, 8)

    def u(k, shape, fan_in):
        bound = 1.0 / jnp.sqrt(float(fan_in))
        return jax.random.uniform(k, shape, jnp.float32, -bound, bound)

    conv1_w = u(ks[0], (C1,), C_IN)               # 1x1 kernels, C_in = 1
    conv1_b = u(ks[1], (C1,), C_IN)
    conv2_w = u(ks[2], (C1, C2), C1)              # stored (in, out)
    conv2_b = u(ks[3], (C2,), C1)
    bn_gamma = jnp.ones((C1,), jnp.float32)       # BatchNorm2d default init
    bn_beta = jnp.zeros((C1,), jnp.float32)

    # fc1 weight stored transposed (in_features, out_features); the input index follows
    # PyTorch's NCHW flatten convention: in = c*HW + hw.
    fc1_wT = u(ks[4], (FC1_IN, FC1_OUT), FC1_IN)
    fc1_b = u(ks[5], (FC1_OUT,), FC1_IN)
    fc2_w = u(ks[6], (FC1_OUT, FC2_OUT), FC1_OUT)
    fc2_b = u(ks[7], (FC2_OUT,), FC1_OUT)

    # Fold the flatten permutation into the fc1 weight layout:
    # fc1w[hw, c, f] = fc1_wT[c*HW + hw, f].  bf16 halves the dominant HBM load.
    fc1_w_blocks = fc1_wT.reshape(C2, HW, FC1_OUT).transpose(1, 0, 2)   # (HW, C2, 500)
    fc1_w_bf16 = fc1_w_blocks.astype(jnp.bfloat16)

    # Pack the seven tiny 1-row vectors into one zero-padded (8, 512) slab.
    slab = jnp.zeros((8, 512), jnp.float32)
    slab = slab.at[0, :C1].set(conv1_w)
    slab = slab.at[1, :C1].set(conv1_b)
    slab = slab.at[2, :C1].set(bn_gamma)
    slab = slab.at[3, :C1].set(bn_beta)
    slab = slab.at[4, :C2].set(conv2_b)
    slab = slab.at[5, :FC1_OUT].set(fc1_b)
    slab = slab.at[6, :FC2_OUT].set(fc2_b)

    kernel_params = {
        "slab": slab,
        "conv2_w": conv2_w,
        "fc1_w": fc1_w_bf16,
        "fc2_w": fc2_w,
    }
    raw_params = {
        "conv1_w": conv1_w, "conv1_b": conv1_b,
        "bn_gamma": bn_gamma, "bn_beta": bn_beta,
        "conv2_w": conv2_w, "conv2_b": conv2_b,
        "fc1_wT": fc1_wT, "fc1_b": fc1_b,
        "fc2_w": fc2_w, "fc2_b": fc2_b,
    }
    # TODO(synk): self.embedding = nn.Embedding(10, 10) is defined but unused in forward();
    # intentionally omitted.
    return kernel_params, raw_params


def reference_forward(x, p):
    """Pure-JAX reference matching the PyTorch forward (training-mode BN, f32 weights)."""
    h1 = x * p["conv1_w"].reshape(1, C1, 1, 1) + p["conv1_b"].reshape(1, C1, 1, 1)
    mean = h1.mean(axis=(0, 2, 3), keepdims=True)
    var = ((h1 - mean) ** 2).mean(axis=(0, 2, 3), keepdims=True)
    h1 = (h1 - mean) / jnp.sqrt(var + BN_EPS)
    h1 = jnp.maximum(h1 * p["bn_gamma"].reshape(1, C1, 1, 1)
                     + p["bn_beta"].reshape(1, C1, 1, 1), 0.0)
    h2 = jnp.einsum("nkhw,kc->nchw", h1, p["conv2_w"]) + p["conv2_b"].reshape(1, C2, 1, 1)
    h2 = jnp.maximum(h2, 0.0)
    hf = h2.reshape(N, FC1_IN)                       # NCHW flatten: in = c*16 + hw
    h3 = jnp.maximum(hf @ p["fc1_wT"] + p["fc1_b"], 0.0)
    logits = h3 @ p["fc2_w"] + p["fc2_b"]
    return jax.nn.log_softmax(logits, axis=1)


if __name__ == "__main__":
    key = jax.random.PRNGKey(0)
    pkey, xkey = jax.random.split(key)
    kernel_params, raw_params = init_params(pkey)

    # Input consistent with forward's view(-1, 4*4*50): NCHW (2, 1, 4, 4)
    x = jax.random.normal(xkey, (N, C_IN, H, W), jnp.float32)

    out = jax.block_until_ready(mock_model_forward(x, kernel_params))

    assert out.shape == (N, FC2_OUT)
    assert bool(jnp.all(jnp.isfinite(out)))
    # log_softmax rows exponentiate-and-sum to ~1
    assert jnp.allclose(jnp.sum(jnp.exp(out), axis=1), 1.0, atol=1e-3)
    # numerics vs pure-JAX reference (loose tol: fc1 weights are bf16 in the kernel)
    ref = reference_forward(x, raw_params)
    assert jnp.allclose(out, ref, atol=3e-2), (out, ref)

    print("KERNEL_OK")
</pallas_src>

<mosaic_0001>
module attributes {stable_mosaic.version = 11 : i64} {
  func.func @fused_kernel(%arg0: memref<32x1xf32, #tpu.memory_space<vmem>>, %arg1: memref<8x512xf32, #tpu.memory_space<vmem>>, %arg2: memref<20x50xf32, #tpu.memory_space<vmem>>, %arg3: memref<16x50x500xbf16, #tpu.memory_space<vmem>>, %arg4: memref<500x10xf32, #tpu.memory_space<vmem>>, %arg5: memref<2x10xf32, #tpu.memory_space<vmem>>, %arg6: memref<32x50xf32, #tpu.memory_space<vmem>>) attributes {dimension_semantics = [], scalar_prefetch = 0 : i64, scratch_operands = 1 : i64, tpu.core_type = #tpu.core_type<tc>} {
    %c0 = arith.constant 0 : index
    %c0_0 = arith.constant 0 : index
    %0 = vector.load %arg0[%c0, %c0_0] : memref<32x1xf32, #tpu.memory_space<vmem>>, vector<32x1xf32>
    %c0_1 = arith.constant 0 : index
    %c0_2 = arith.constant 0 : index
    %1 = vector.load %arg1[%c0_1, %c0_2] : memref<8x512xf32, #tpu.memory_space<vmem>>, vector<1x20xf32>
    %c1 = arith.constant 1 : index
    %c0_3 = arith.constant 0 : index
    %2 = vector.load %arg1[%c1, %c0_3] : memref<8x512xf32, #tpu.memory_space<vmem>>, vector<1x20xf32>
    %c2 = arith.constant 2 : index
    %c0_4 = arith.constant 0 : index
    %3 = vector.load %arg1[%c2, %c0_4] : memref<8x512xf32, #tpu.memory_space<vmem>>, vector<1x20xf32>
    %c3 = arith.constant 3 : index
    %c0_5 = arith.constant 0 : index
    %4 = vector.load %arg1[%c3, %c0_5] : memref<8x512xf32, #tpu.memory_space<vmem>>, vector<1x20xf32>
    %5 = vector.broadcast %0 : vector<32x1xf32> to vector<32x20xf32>
    %6 = vector.broadcast %1 : vector<1x20xf32> to vector<32x20xf32>
    %7 = arith.mulf %5, %6 : vector<32x20xf32>
    %8 = vector.broadcast %2 : vector<1x20xf32> to vector<32x20xf32>
    %9 = arith.addf %7, %8 : vector<32x20xf32>
    %cst = arith.constant dense<0.000000e+00> : vector<20xf32>
    %10 = vector.multi_reduction <add>, %9, %cst [0] : vector<32x20xf32> to vector<20xf32>
    %11 = vector.shape_cast %10 : vector<20xf32> to vector<1x20xf32>
    %cst_6 = arith.constant 3.200000e+01 : f32
    %12 = vector.broadcast %cst_6 : f32 to vector<1x20xf32>
    %13 = arith.divf %11, %12 : vector<1x20xf32>
    %14 = vector.broadcast %13 : vector<1x20xf32> to vector<32x20xf32>
    %15 = arith.subf %9, %14 : vector<32x20xf32>
    %16 = arith.mulf %15, %15 : vector<32x20xf32>
    %cst_7 = arith.constant dense<0.000000e+00> : vector<20xf32>
    %17 = vector.multi_reduction <add>, %16, %cst_7 [0] : vector<32x20xf32> to vector<20xf32>
    %18 = vector.shape_cast %17 : vector<20xf32> to vector<1x20xf32>
    %cst_8 = arith.constant 3.200000e+01 : f32
    %19 = vector.broadcast %cst_8 : f32 to vector<1x20xf32>
    %20 = arith.divf %18, %19 : vector<1x20xf32>
    %cst_9 = arith.constant 9.99999974E-6 : f32
    %21 = vector.broadcast %cst_9 : f32 to vector<1x20xf32>
    %22 = arith.addf %20, %21 : vector<1x20xf32>
    %23 = math.rsqrt %22 : vector<1x20xf32>
    %24 = vector.broadcast %23 : vector<1x20xf32> to vector<32x20xf32>
    %25 = arith.mulf %15, %24 : vector<32x20xf32>
    %26 = vector.broadcast %3 : vector<1x20xf32> to vector<32x20xf32>
    %27 = arith.mulf %25, %26 : vector<32x20xf32>
    %28 = vector.broadcast %4 : vector<1x20xf32> to vector<32x20xf32>
    %29 = arith.addf %27, %28 : vector<32x20xf32>
    %cst_10 = arith.constant 0.000000e+00 : f32
    %30 = vector.broadcast %cst_10 : f32 to vector<32x20xf32>
    %31 = arith.maximumf %29, %30 : vector<32x20xf32>
    %c4 = arith.constant 4 : index
    %c0_11 = arith.constant 0 : index
    %32 = vector.load %arg1[%c4, %c0_11] : memref<8x512xf32, #tpu.memory_space<vmem>>, vector<1x50xf32>
    %c0_12 = arith.constant 0 : index
    %c0_13 = arith.constant 0 : index
    %33 = vector.load %arg2[%c0_12, %c0_13] : memref<20x50xf32, #tpu.memory_space<vmem>>, vector<20x50xf32>
    %cst_14 = arith.constant dense<0.000000e+00> : vector<32x50xf32>
    %34 = tpu.matmul %31, %33, %cst_14 {dimension_numbers = #tpu.dot_dimension_numbers<[1], [0], [0], [1], [0, 0, 1, 1], [], []>} : vector<32x20xf32>, vector<20x50xf32>, vector<32x50xf32> -> vector<32x50xf32>
    %35 = vector.broadcast %32 : vector<1x50xf32> to vector<32x50xf32>
    %36 = arith.addf %34, %35 : vector<32x50xf32>
    %cst_15 = arith.constant 0.000000e+00 : f32
    %37 = vector.broadcast %cst_15 : f32 to vector<32x50xf32>
    %38 = arith.maximumf %36, %37 : vector<32x50xf32>
    %c0_16 = arith.constant 0 : index
    %c0_17 = arith.constant 0 : index
    %39 = vector.load %arg6[%c0_16, %c0_17] : memref<32x50xf32, #tpu.memory_space<vmem>>, vector<32x50xf32>
    tpu.vector_store %arg6[%c0_16, %c0_17], %38 {strides = array<i32>} : memref<32x50xf32, #tpu.memory_space<vmem>>, vector<32x50xf32>,
    %c5 = arith.constant 5 : index
    %c0_18 = arith.constant 0 : index
    %40 = vector.load %arg1[%c5, %c0_18] : memref<8x512xf32, #tpu.memory_space<vmem>>, vector<1x500xf32>
    %cst_19 = arith.constant 0.000000e+00 : f32
    %41 = vector.broadcast %cst_19 : f32 to vector<2x500xf32>
    %c0_20 = arith.constant 0 : index
    %c0_21 = arith.constant 0 : index
    %42 = vector.load %arg6[%c0_20, %c0_21] : memref<32x50xf32, #tpu.memory_space<vmem>>, vector<2x50xf32>
    %43 = arith.truncf %42 : vector<2x50xf32> to vector<2x50xbf16>
    %c0_22 = arith.constant 0 : index
    %c0_23 = arith.constant 0 : index
    %c0_24 = arith.constant 0 : index
    %44 = vector.load %arg3[%c0_22, %c0_23, %c0_24] : memref<16x50x500xbf16, #tpu.memory_space<vmem>>, vector<1x50x500xbf16>
    %45 = vector.shape_cast %44 : vector<1x50x500xbf16> to vector<50x500xbf16>
    %cst_25 = arith.constant dense<0.000000e+00> : vector<2x500xf32>
    %46 = tpu.matmul %43, %45, %cst_25 {dimension_numbers = #tpu.dot_dimension_numbers<[1], [0], [0], [1], [0, 0, 1, 1], [], []>} : vector<2x50xbf16>, vector<50x500xbf16>, vector<2x500xf32> -> vector<2x500xf32>
    %47 = arith.addf %41, %46 : vector<2x500xf32>
    %c2_26 = arith.constant 2 : index
    %c0_27 = arith.constant 0 : index
    %48 = vector.load %arg6[%c2_26, %c0_27] : memref<32x50xf32, #tpu.memory_space<vmem>>, vector<2x50xf32>
    %49 = arith.truncf %48 : vector<2x50xf32> to vector<2x50xbf16>
    %c1_28 = arith.constant 1 : index
    %c0_29 = arith.constant 0 : index
    %c0_30 = arith.constant 0 : index
    %50 = vector.load %arg3[%c1_28, %c0_29, %c0_30] : memref<16x50x500xbf16, #tpu.memory_space<vmem>>, vector<1x50x500xbf16>
    %51 = vector.shape_cast %50 : vector<1x50x500xbf16> to vector<50x500xbf16>
    %cst_31 = arith.constant dense<0.000000e+00> : vector<2x500xf32>
    %52 = tpu.matmul %49, %51, %cst_31 {dimension_numbers = #tpu.dot_dimension_numbers<[1], [0], [0], [1], [0, 0, 1, 1], [], []>} : vector<2x50xbf16>, vector<50x500xbf16>, vector<2x500xf32> -> vector<2x500xf32>
    %53 = arith.addf %47, %52 : vector<2x500xf32>
    %c4_32 = arith.constant 4 : index
    %c0_33 = arith.constant 0 : index
    %54 = vector.load %arg6[%c4_32, %c0_33] : memref<32x50xf32, #tpu.memory_space<vmem>>, vector<2x50xf32>
    %55 = arith.truncf %54 : vector<2x50xf32> to vector<2x50xbf16>
    %c2_34 = arith.constant 2 : index
    %c0_35 = arith.constant 0 : index
    %c0_36 = arith.constant 0 : index
    %56 = vector.load %arg3[%c2_34, %c0_35, %c0_36] : memref<16x50x500xbf16, #tpu.memory_space<vmem>>, vector<1x50x500xbf16>
    %57 = vector.shape_cast %56 : vector<1x50x500xbf16> to vector<50x500xbf16>
    %cst_37 = arith.constant dense<0.000000e+00> : vector<2x500xf32>
    %58 = tpu.matmul %55, %57, %cst_37 {dimension_numbers = #tpu.dot_dimension_numbers<[1], [0], [0], [1], [0, 0, 1, 1], [], []>} : vector<2x50xbf16>, vector<50x500xbf16>, vector<2x500xf32> -> vector<2x500xf32>
    %59 = arith.addf %53, %58 : vector<2x500xf32>
    %c6 = arith.constant 6 : index
    %c0_38 = arith.constant 0 : index
    %60 = vector.load %arg6[%c6, %c0_38] : memref<32x50xf32, #tpu.memory_space<vmem>>, vector<2x50xf32>
    %61 = arith.truncf %60 : vector<2x50xf32> to vector<2x50xbf16>
    %c3_39 = arith.constant 3 : index
    %c0_40 = arith.constant 0 : index
    %c0_41 = arith.constant 0 : index
    %62 = vector.load %arg3[%c3_39, %c0_40, %c0_41] : memref<16x50x500xbf16, #tpu.memory_space<vmem>>, vector<1x50x500xbf16>
    %63 = vector.shape_cast %62 : vector<1x50x500xbf16> to vector<50x500xbf16>
    %cst_42 = arith.constant dense<0.000000e+00> : vector<2x500xf32>
    %64 = tpu.matmul %61, %63, %cst_42 {dimension_numbers = #tpu.dot_dimension_numbers<[1], [0], [0], [1], [0, 0, 1, 1], [], []>} : vector<2x50xbf16>, vector<50x500xbf16>, vector<2x500xf32> -> vector<2x500xf32>
    %65 = arith.addf %59, %64 : vector<2x500xf32>
    %c8 = arith.constant 8 : index
    %c0_43 = arith.constant 0 : index
    %66 = vector.load %arg6[%c8, %c0_43] : memref<32x50xf32, #tpu.memory_space<vmem>>, vector<2x50xf32>
    %67 = arith.truncf %66 : vector<2x50xf32> to vector<2x50xbf16>
    %c4_44 = arith.constant 4 : index
    %c0_45 = arith.constant 0 : index
    %c0_46 = arith.constant 0 : index
    %68 = vector.load %arg3[%c4_44, %c0_45, %c0_46] : memref<16x50x500xbf16, #tpu.memory_space<vmem>>, vector<1x50x500xbf16>
    %69 = vector.shape_cast %68 : vector<1x50x500xbf16> to vector<50x500xbf16>
    %cst_47 = arith.constant dense<0.000000e+00> : vector<2x500xf32>
    %70 = tpu.matmul %67, %69, %cst_47 {dimension_numbers = #tpu.dot_dimension_numbers<[1], [0], [0], [1], [0, 0, 1, 1], [], []>} : vector<2x50xbf16>, vector<50x500xbf16>, vector<2x500xf32> -> vector<2x500xf32>
    %71 = arith.addf %65, %70 : vector<2x500xf32>
    %c10 = arith.constant 10 : index
    %c0_48 = arith.constant 0 : index
    %72 = vector.load %arg6[%c10, %c0_48] : memref<32x50xf32, #tpu.memory_space<vmem>>, vector<2x50xf32>
    %73 = arith.truncf %72 : vector<2x50xf32> to vector<2x50xbf16>
    %c5_49 = arith.constant 5 : index
    %c0_50 = arith.constant 0 : index
    %c0_51 = arith.constant 0 : index
    %74 = vector.load %arg3[%c5_49, %c0_50, %c0_51] : memref<16x50x500xbf16, #tpu.memory_space<vmem>>, vector<1x50x500xbf16>
    %75 = vector.shape_cast %74 : vector<1x50x500xbf16> to vector<50x500xbf16>
    %cst_52 = arith.constant dense<0.000000e+00> : vector<2x500xf32>
    %76 = tpu.matmul %73, %75, %cst_52 {dimension_numbers = #tpu.dot_dimension_numbers<[1], [0], [0], [1], [0, 0, 1, 1], [], []>} : vector<2x50xbf16>, vector<50x500xbf16>, vector<2x500xf32> -> vector<2x500xf32>
    %77 = arith.addf %71, %76 : vector<2x500xf32>
    %c12 = arith.constant 12 : index
    %c0_53 = arith.constant 0 : index
    %78 = vector.load %arg6[%c12, %c0_53] : memref<32x50xf32, #tpu.memory_space<vmem>>, vector<2x50xf32>
    %79 = arith.truncf %78 : vector<2x50xf32> to vector<2x50xbf16>
    %c6_54 = arith.constant 6 : index
    %c0_55 = arith.constant 0 : index
    %c0_56 = arith.constant 0 : index
    %80 = vector.load %arg3[%c6_54, %c0_55, %c0_56] : memref<16x50x500xbf16, #tpu.memory_space<vmem>>, vector<1x50x500xbf16>
    %81 = vector.shape_cast %80 : vector<1x50x500xbf16> to vector<50x500xbf16>
    %cst_57 = arith.constant dense<0.000000e+00> : vector<2x500xf32>
    %82 = tpu.matmul %79, %81, %cst_57 {dimension_numbers = #tpu.dot_dimension_numbers<[1], [0], [0], [1], [0, 0, 1, 1], [], []>} : vector<2x50xbf16>, vector<50x500xbf16>, vector<2x500xf32> -> vector<2x500xf32>
    %83 = arith.addf %77, %82 : vector<2x500xf32>
    %c14 = arith.constant 14 : index
    %c0_58 = arith.constant 0 : index
    %84 = vector.load %arg6[%c14, %c0_58] : memref<32x50xf32, #tpu.memory_space<vmem>>, vector<2x50xf32>
    %85 = arith.truncf %84 : vector<2x50xf32> to vector<2x50xbf16>
    %c7 = arith.constant 7 : index
    %c0_59 = arith.constant 0 : index
    %c0_60 = arith.constant 0 : index
    %86 = vector.load %arg3[%c7, %c0_59, %c0_60] : memref<16x50x500xbf16, #tpu.memory_space<vmem>>, vector<1x50x500xbf16>
    %87 = vector.shape_cast %86 : vector<1x50x500xbf16> to vector<50x500xbf16>
    %cst_61 = arith.constant dense<0.000000e+00> : vector<2x500xf32>
    %88 = tpu.matmul %85, %87, %cst_61 {dimension_numbers = #tpu.dot_dimension_numbers<[1], [0], [0], [1], [0, 0, 1, 1], [], []>} : vector<2x50xbf16>, vector<50x500xbf16>, vector<2x500xf32> -> vector<2x500xf32>
    %89 = arith.addf %83, %88 : vector<2x500xf32>
    %c16 = arith.constant 16 : index
    %c0_62 = arith.constant 0 : index
    %90 = vector.load %arg6[%c16, %c0_62] : memref<32x50xf32, #tpu.memory_space<vmem>>, vector<2x50xf32>
    %91 = arith.truncf %90 : vector<2x50xf32> to vector<2x50xbf16>
    %c8_63 = arith.constant 8 : index
    %c0_64 = arith.constant 0 : index
    %c0_65 = arith.constant 0 : index
    %92 = vector.load %arg3[%c8_63, %c0_64, %c0_65] : memref<16x50x500xbf16, #tpu.memory_space<vmem>>, vector<1x50x500xbf16>
    %93 = vector.shape_cast %92 : vector<1x50x500xbf16> to vector<50x500xbf16>
    %cst_66 = arith.constant dense<0.000000e+00> : vector<2x500xf32>
    %94 = tpu.matmul %91, %93, %cst_66 {dimension_numbers = #tpu.dot_dimension_numbers<[1], [0], [0], [1], [0, 0, 1, 1], [], []>} : vector<2x50xbf16>, vector<50x500xbf16>, vector<2x500xf32> -> vector<2x500xf32>
    %95 = arith.addf %89, %94 : vector<2x500xf32>
    %c18 = arith.constant 18 : index
    %c0_67 = arith.constant 0 : index
    %96 = vector.load %arg6[%c18, %c0_67] : memref<32x50xf32, #tpu.memory_space<vmem>>, vector<2x50xf32>
    %97 = arith.truncf %96 : vector<2x50xf32> to vector<2x50xbf16>
    %c9 = arith.constant 9 : index
    %c0_68 = arith.constant 0 : index
    %c0_69 = arith.constant 0 : index
    %98 = vector.load %arg3[%c9, %c0_68, %c0_69] : memref<16x50x500xbf16, #tpu.memory_space<vmem>>, vector<1x50x500xbf16>
    %99 = vector.shape_cast %98 : vector<1x50x500xbf16> to vector<50x500xbf16>
    %cst_70 = arith.constant dense<0.000000e+00> : vector<2x500xf32>
    %100 = tpu.matmul %97, %99, %cst_70 {dimension_numbers = #tpu.dot_dimension_numbers<[1], [0], [0], [1], [0, 0, 1, 1], [], []>} : vector<2x50xbf16>, vector<50x500xbf16>, vector<2x500xf32> -> vector<2x500xf32>
    %101 = arith.addf %95, %100 : vector<2x500xf32>
    %c20 = arith.constant 20 : index
    %c0_71 = arith.constant 0 : index
    %102 = vector.load %arg6[%c20, %c0_71] : memref<32x50xf32, #tpu.memory_space<vmem>>, vector<2x50xf32>
    %103 = arith.truncf %102 : vector<2x50xf32> to vector<2x50xbf16>
    %c10_72 = arith.constant 10 : index
    %c0_73 = arith.constant 0 : index
    %c0_74 = arith.constant 0 : index
    %104 = vector.load %arg3[%c10_72, %c0_73, %c0_74] : memref<16x50x500xbf16, #tpu.memory_space<vmem>>, vector<1x50x500xbf16>
    %105 = vector.shape_cast %104 : vector<1x50x500xbf16> to vector<50x500xbf16>
    %cst_75 = arith.constant dense<0.000000e+00> : vector<2x500xf32>
    %106 = tpu.matmul %103, %105, %cst_75 {dimension_numbers = #tpu.dot_dimension_numbers<[1], [0], [0], [1], [0, 0, 1, 1], [], []>} : vector<2x50xbf16>, vector<50x500xbf16>, vector<2x500xf32> -> vector<2x500xf32>
    %107 = arith.addf %101, %106 : vector<2x500xf32>
    %c22 = arith.constant 22 : index
    %c0_76 = arith.constant 0 : index
    %108 = vector.load %arg6[%c22, %c0_76] : memref<32x50xf32, #tpu.memory_space<vmem>>, vector<2x50xf32>
    %109 = arith.truncf %108 : vector<2x50xf32> to vector<2x50xbf16>
    %c11 = arith.constant 11 : index
    %c0_77 = arith.constant 0 : index
    %c0_78 = arith.constant 0 : index
    %110 = vector.load %arg3[%c11, %c0_77, %c0_78] : memref<16x50x500xbf16, #tpu.memory_space<vmem>>, vector<1x50x500xbf16>
    %111 = vector.shape_cast %110 : vector<1x50x500xbf16> to vector<50x500xbf16>
    %cst_79 = arith.constant dense<0.000000e+00> : vector<2x500xf32>
    %112 = tpu.matmul %109, %111, %cst_79 {dimension_numbers = #tpu.dot_dimension_numbers<[1], [0], [0], [1], [0, 0, 1, 1], [], []>} : vector<2x50xbf16>, vector<50x500xbf16>, vector<2x500xf32> -> vector<2x500xf32>
    %113 = arith.addf %107, %112 : vector<2x500xf32>
    %c24 = arith.constant 24 : index
    %c0_80 = arith.constant 0 : index
    %114 = vector.load %arg6[%c24, %c0_80] : memref<32x50xf32, #tpu.memory_space<vmem>>, vector<2x50xf32>
    %115 = arith.truncf %114 : vector<2x50xf32> to vector<2x50xbf16>
    %c12_81 = arith.constant 12 : index
    %c0_82 = arith.constant 0 : index
    %c0_83 = arith.constant 0 : index
    %116 = vector.load %arg3[%c12_81, %c0_82, %c0_83] : memref<16x50x500xbf16, #tpu.memory_space<vmem>>, vector<1x50x500xbf16>
    %117 = vector.shape_cast %116 : vector<1x50x500xbf16> to vector<50x500xbf16>
    %cst_84 = arith.constant dense<0.000000e+00> : vector<2x500xf32>
    %118 = tpu.matmul %115, %117, %cst_84 {dimension_numbers = #tpu.dot_dimension_numbers<[1], [0], [0], [1], [0, 0, 1, 1], [], []>} : vector<2x50xbf16>, vector<50x500xbf16>, vector<2x500xf32> -> vector<2x500xf32>
    %119 = arith.addf %113, %118 : vector<2x500xf32>
    %c26 = arith.constant 26 : index
    %c0_85 = arith.constant 0 : index
    %120 = vector.load %arg6[%c26, %c0_85] : memref<32x50xf32, #tpu.memory_space<vmem>>, vector<2x50xf32>
    %121 = arith.truncf %120 : vector<2x50xf32> to vector<2x50xbf16>
    %c13 = arith.constant 13 : index
    %c0_86 = arith.constant 0 : index
    %c0_87 = arith.constant 0 : index
    %122 = vector.load %arg3[%c13, %c0_86, %c0_87] : memref<16x50x500xbf16, #tpu.memory_space<vmem>>, vector<1x50x500xbf16>
    %123 = vector.shape_cast %122 : vector<1x50x500xbf16> to vector<50x500xbf16>
    %cst_88 = arith.constant dense<0.000000e+00> : vector<2x500xf32>
    %124 = tpu.matmul %121, %123, %cst_88 {dimension_numbers = #tpu.dot_dimension_numbers<[1], [0], [0], [1], [0, 0, 1, 1], [], []>} : vector<2x50xbf16>, vector<50x500xbf16>, vector<2x500xf32> -> vector<2x500xf32>
    %125 = arith.addf %119, %124 : vector<2x500xf32>
    %c28 = arith.constant 28 : index
    %c0_89 = arith.constant 0 : index
    %126 = vector.load %arg6[%c28, %c0_89] : memref<32x50xf32, #tpu.memory_space<vmem>>, vector<2x50xf32>
    %127 = arith.truncf %126 : vector<2x50xf32> to vector<2x50xbf16>
    %c14_90 = arith.constant 14 : index
    %c0_91 = arith.constant 0 : index
    %c0_92 = arith.constant 0 : index
    %128 = vector.load %arg3[%c14_90, %c0_91, %c0_92] : memref<16x50x500xbf16, #tpu.memory_space<vmem>>, vector<1x50x500xbf16>
    %129 = vector.shape_cast %128 : vector<1x50x500xbf16> to vector<50x500xbf16>
    %cst_93 = arith.constant dense<0.000000e+00> : vector<2x500xf32>
    %130 = tpu.matmul %127, %129, %cst_93 {dimension_numbers = #tpu.dot_dimension_numbers<[1], [0], [0], [1], [0, 0, 1, 1], [], []>} : vector<2x50xbf16>, vector<50x500xbf16>, vector<2x500xf32> -> vector<2x500xf32>
    %131 = arith.addf %125, %130 : vector<2x500xf32>
    %c30 = arith.constant 30 : index
    %c0_94 = arith.constant 0 : index
    %132 = vector.load %arg6[%c30, %c0_94] : memref<32x50xf32, #tpu.memory_space<vmem>>, vector<2x50xf32>
    %133 = arith.truncf %132 : vector<2x50xf32> to vector<2x50xbf16>
    %c15 = arith.constant 15 : index
    %c0_95 = arith.constant 0 : index
    %c0_96 = arith.constant 0 : index
    %134 = vector.load %arg3[%c15, %c0_95, %c0_96] : memref<16x50x500xbf16, #tpu.memory_space<vmem>>, vector<1x50x500xbf16>
    %135 = vector.shape_cast %134 : vector<1x50x500xbf16> to vector<50x500xbf16>
    %cst_97 = arith.constant dense<0.000000e+00> : vector<2x500xf32>
    %136 = tpu.matmul %133, %135, %cst_97 {dimension_numbers = #tpu.dot_dimension_numbers<[1], [0], [0], [1], [0, 0, 1, 1], [], []>} : vector<2x50xbf16>, vector<50x500xbf16>, vector<2x500xf32> -> vector<2x500xf32>
    %137 = arith.addf %131, %136 : vector<2x500xf32>
    %138 = vector.broadcast %40 : vector<1x500xf32> to vector<2x500xf32>
    %139 = arith.addf %137, %138 : vector<2x500xf32>
    %cst_98 = arith.constant 0.000000e+00 : f32
    %140 = vector.broadcast %cst_98 : f32 to vector<2x500xf32>
    %141 = arith.maximumf %139, %140 : vector<2x500xf32>
    %c6_99 = arith.constant 6 : index
    %c0_100 = arith.constant 0 : index
    %142 = vector.load %arg1[%c6_99, %c0_100] : memref<8x512xf32, #tpu.memory_space<vmem>>, vector<1x10xf32>
    %c0_101 = arith.constant 0 : index
    %c0_102 = arith.constant 0 : index
    %143 = vector.load %arg4[%c0_101, %c0_102] : memref<500x10xf32, #tpu.memory_space<vmem>>, vector<500x10xf32>
    %cst_103 = arith.constant dense<0.000000e+00> : vector<2x10xf32>
    %144 = tpu.matmul %141, %143, %cst_103 {dimension_numbers = #tpu.dot_dimension_numbers<[1], [0], [0], [1], [0, 0, 1, 1], [], []>} : vector<2x500xf32>, vector<500x10xf32>, vector<2x10xf32> -> vector<2x10xf32>
    %145 = vector.broadcast %142 : vector<1x10xf32> to vector<2x10xf32>
    %146 = arith.addf %144, %145 : vector<2x10xf32>
    %cst_104 = arith.constant dense<0xFF800000> : vector<2xf32>
    %147 = vector.multi_reduction <maximumf>, %146, %cst_104 [1] : vector<2x10xf32> to vector<2xf32>
    %148 = vector.shape_cast %147 : vector<2xf32> to vector<2x1xf32>
    %149 = vector.broadcast %148 : vector<2x1xf32> to vector<2x10xf32>
    %150 = arith.subf %146, %149 : vector<2x10xf32>
    %151 = math.exp %150 : vector<2x10xf32>
    %cst_105 = arith.constant dense<0.000000e+00> : vector<2xf32>
    %152 = vector.multi_reduction <add>, %151, %cst_105 [1] : vector<2x10xf32> to vector<2xf32>
    %153 = vector.shape_cast %152 : vector<2xf32> to vector<2x1xf32>
    %154 = math.log %153 : vector<2x1xf32>
    %155 = arith.addf %148, %154 : vector<2x1xf32>
    %156 = vector.broadcast %155 : vector<2x1xf32> to vector<2x10xf32>
    %157 = arith.subf %146, %156 : vector<2x10xf32>
    %c0_106 = arith.constant 0 : index
    %c0_107 = arith.constant 0 : index
    %158 = vector.load %arg5[%c0_106, %c0_107] : memref<2x10xf32, #tpu.memory_space<vmem>>, vector<2x10xf32>
    tpu.vector_store %arg5[%c0_106, %c0_107], %157 {strides = array<i32>} : memref<2x10xf32, #tpu.memory_space<vmem>>, vector<2x10xf32>,
    return
  }
}

</mosaic_0001>

<bundles_post_ra>
// kernel: mock_model_forward.1
= control target key start
LH: loop header
LB: loop body
LE: loop exit
PB: predicated region body
PF: predicated region fallthrough
CT: control target
= control target key end

     0   :  { %v4558_v2 = vmov 0   ;;  %s5746_s0 = inlined_call_operand.vmem [shape: f32[32,1], index: 0, kind: input, shape index: {}]   ;;  %s5747_s1 = inlined_call_operand.vmem [shape: f32[8,512], index: 1, kind: input, shape index: {}]   ;;  %s5748_s2 = inlined_call_operand.vmem [shape: f32[20,50], index: 2, kind: input, shape index: {}]   ;;  %s5749_s3 = inlined_call_operand.vmem [shape: bf16[16,50,500], index: 3, kind: input, shape index: {}]   ;;  %s5750_s4 = inlined_call_operand.vmem [shape: f32[500,10], index: 4, kind: input, shape index: {}]   ;;  %s5751_s5 = inlined_call_operand.hbm [shape: f32[2,10], index: 5, kind: output, shape index: {}]  }
   0x1   :  { %v24_v0 = vld [vmem:[%s5746_s0 + $0x10] sm:$0xff]  ;;  %v22_v1 = vld [vmem:[%s5746_s0] sm:$0xff]  ;;  %4177 = vset.pattern.permute.xlu1 %v4558_v2  ;;  %4176 = vset.pattern.permute.xlu0 %v4558_v2  ;;  %v25_v3 = vld [vmem:[%s5746_s0 + $0x18] sm:$0xff] }
   0x2   :  { %v23_v4 = vld [vmem:[%s5746_s0 + $0x8] sm:$0xff]  ;;  %42 = vperm.xlu1 %4177, %v24_v0   ;;  %32 = vperm.xlu0 %4176, %v22_v1  }
   0x3   :  { %381 = vmatprep.mubr.bf16.mxu1 %v4558_v2 }
   0x6   :  { %47 = vperm.xlu1 %4177, %v25_v3   ;;  %37 = vperm.xlu0 %4176, %v23_v4  }
   0x7   :  { %10 = vsyncpa [#allocation4], 0  ;;  %v115_v5 = vld [vmem:[%s5748_s2] sm:$0xff]  ;;  %v116_v6 = vld [vmem:[%s5748_s2 + $0x8] sm:$0xff]  ;;  %vm130_vm0 = vcmask 1043456   ;;  %vm58_vm1 = vcmask 162816  }
   0x8   :  { %v4091_v7 = vpack.c.bf16 %v116_v6, %v115_v5  ;;  %v117_v8 = vld [vmem:[%s5748_s2 + $0x10] sm:$0xf]  ;;  %v4178_v9 = vld [vmem:[%s5749_s3 + $0x74] ss:$16 sps:$4 sm:$0xff]   ;;  %v4182_v10 = vld [vmem:[%s5749_s3 + $0xc] ss:$16 sps:$4 sm:$0xff]  }
   0x9   :  { %349 = vmatprep.subr.bf16.mxu1 %v4178_v9  ;;  %v26_v11 = vld [vmem:[%s5747_s1] ss:$0 sm:$0xff]  ;;  %v27_v15 = vld [vmem:[%s5747_s1 + $0x1] ss:$0 sm:$0xff]  ;;  %v28_v63 = vld [vmem:[%s5747_s1 + $0x2] ss:$0 sm:$0xff] }
   0xa   :  { %4092 = vmatprep.subr.bf16.mxu0 %v4091_v7  ;;  %v29_v5 = vld [vmem:[%s5747_s1 + $0x3] ss:$0 sm:$0xff]  ;;  %vm336_vm2 = vcmask 1040384   ;;  %vm223_vm3 = vcmask 408576   ;;  %vm3323_vm4 = vcmask 949248   ;;  %vm3470_vm5 = vcmask 74752  }
   0xb   :  { %4094 = vmatpush3.bf16.msra.mxu0 %v4091_v7 }
   0xc   :  { %4083 = vmatprep.subr.msk.mxu0 %vm130_vm0, %v117_v8 }
   0xf   :  { %4084 = vmatpush3.msk.msra.mxu0 %vm130_vm0, %v117_v8 }
  0x10   :  { %557 = vmatprep.subr.bf16.mxu0 %v4182_v10 }
  0x81   :  { %v43_v12 = vpop.permute.xlu1 %42  ;;  %v33_v13 = vpop.permute.xlu0 %32 }
  0x82   :  { %v50_v14 = vmul.f32 %v33_v13, %v26_v11  ;;  %v52_v16 = vmul.f32 %v43_v12, %v26_v11 }
  0x84   :  { %v54_v19 = vadd.f32 %v50_v14, %v27_v15  ;;  %v56_v22 = vadd.f32 %v52_v16, %v27_v15 }
  0x85   :  { %v48_v17 = vpop.permute.xlu1 %47  ;;  %v38_v18 = vpop.permute.xlu0 %37 }
  0x86   :  { %v53_v20 = vmul.f32 %v48_v17, %v26_v11  ;;  %v51_v21 = vmul.f32 %v38_v18, %v26_v11  ;;  %v59_v24 = vsel %vm58_vm1, %v54_v19, 0.0  ;;  %v62_v28 = vsel %vm58_vm1, %v56_v22, 0.0 }
  0x88   :  { %v55_v23 = vadd.f32 %v51_v21, %v27_v15  ;;  %v57_v25 = vadd.f32 %v53_v20, %v27_v15  ;;  %v4180_v15 = vld [vmem:[%s5749_s3 + $0x8] ss:$16 sps:$4 sm:$0xff]   ;;  %v3507_v20 = vld [vmem:[%s5749_s3 + $0x80] sm:$0xff] }
  0x8a   :  { %v60_v26 = vsel %vm58_vm1, %v55_v23, 0.0  ;;  %v64_v30 = vsel %vm58_vm1, %v57_v25, 0.0 }
  0x8b   :  { %v61_v27 = vadd.f32 %v60_v26, %v59_v24  ;;  %v4183_v24 = vld [vmem:[%s5749_s3 + $0x94] ss:$16 sps:$4 sm:$0xff]   ;;  %v4187_v26 = vld [vmem:[%s5749_s3 + $0x2c] ss:$16 sps:$4 sm:$0xff]  }
  0x8d   :  { %v63_v29 = vadd.f32 %v62_v28, %v61_v27  ;;  %v4188_v28 = vld [vmem:[%s5749_s3 + $0xb4] ss:$16 sps:$4 sm:$0xff]  }
  0x8f   :  { %v65_v31 = vadd.f32 %v64_v30, %v63_v29  ;;  %v4192_v29 = vld [vmem:[%s5749_s3 + $0x4c] ss:$16 sps:$4 sm:$0xff]   ;;  %v4190_v30 = vld [vmem:[%s5749_s3 + $0x48] ss:$16 sps:$4 sm:$0xff]  }
  0x91   :  { %v66_v32 = vrot.slane %v65_v31, 4 }
  0x93   :  { %v67_v33 = vadd.f32 %v66_v32, %v65_v31  ;;  %v4193_v31 = vld [vmem:[%s5749_s3 + $0xb0] ss:$16 sps:$4 sm:$0xff]  }
  0x94   :  { %v3517_v32 = vld [vmem:[%s5749_s3 + $0xd0] sm:$0x11] }
  0x95   :  { %v68_v34 = vrot.slane %v67_v33, 2 }
  0x97   :  { %v69_v35 = vadd.f32 %v68_v34, %v67_v33  ;;  %v245_v33 = vld [vmem:[%s5749_s3 + $0x68] sm:$0x11]  ;;  %v3532_v34 = vcombine.high %v3517_v32, %v3517_v32 }
  0x99   :  { %v70_v36 = vrot.slane %v69_v35, 1 }
  0x9b   :  { %v71_v37 = vadd.f32 %v70_v36, %v69_v35  ;;  %v3554_v35 = vcombine.high %v245_v33, %v245_v33  ;;  %v3531_v36 = vcombine.low %v3517_v32, %v3517_v32 }
  0x9d   :  { %v73_v38 = vmul.f32 0.03125, %v71_v37  ;;  %v3553_v37 = vcombine.low %v245_v33, %v245_v33 }
  0x9f   :  { %v74_v39 = vsub.f32 %v54_v19, %v73_v38  ;;  %v75_v40 = vsub.f32 %v55_v23, %v73_v38  ;;  %v76_v41 = vsub.f32 %v56_v22, %v73_v38  ;;  %v77_v42 = vsub.f32 %v57_v25, %v73_v38  ;;  %v3505_v19 = vld [vmem:[%s5749_s3 + $0x70] sm:$0xff]  ;;  %v3511_v23 = vld [vmem:[%s5749_s3 + $0xa0] sm:$0xff]  ;;  %v4185_v25 = vld [vmem:[%s5749_s3 + $0x28] ss:$16 sps:$4 sm:$0xff]  }
  0xa0   :  { %v3519_v21 = vcombine.low %v3505_v19, %v3507_v20  ;;  %v3509_v22 = vld [vmem:[%s5749_s3 + $0x90] sm:$0xff]  ;;  %v4200_v38 = vld [vmem:[%s5749_s3 + $0x7c] ss:$16 sps:$4 sm:$0xff]  }
  0xa1   :  { %v78_v43 = vmul.f32 %v74_v39, %v74_v39  ;;  %v79_v44 = vmul.f32 %v75_v40, %v75_v40  ;;  %v80_v45 = vmul.f32 %v76_v41, %v76_v41  ;;  %v81_v46 = vmul.f32 %v77_v42, %v77_v42  ;;  %v4228_v20 = vld [vmem:[%s5749_s3 + $0x24] ss:$16 sps:$4 sm:$0xff]  }
  0xa2   :  { %350 = vmatpush1.bf16.msra.mxu1 %v3519_v21  ;;  %v3523_v27 = vcombine.low %v3509_v22, %v3511_v23  ;;  %v4231_v21 = vld [vmem:[%s5749_s3 + $0x17c] ss:$16 sps:$4 sm:$0xff]   ;;  %v4226_v22 = vld [vmem:[%s5749_s3 + $0x20] ss:$16 sps:$4 sm:$0xff]   ;;  %v4229_v23 = vld [vmem:[%s5749_s3 + $0x178] ss:$16 sps:$4 sm:$0xff]  }
  0xa3   :  { %v82_v47 = vsel %vm58_vm1, %v78_v43, 0.0  ;;  %v83_v48 = vsel %vm58_vm1, %v79_v44, 0.0  ;;  %v85_v50 = vsel %vm58_vm1, %v80_v45, 0.0  ;;  %v87_v52 = vsel %vm58_vm1, %v81_v46, 0.0  ;;  %351 = vmatprep.subr.bf16.mxu1 %v4183_v24  ;;  %v4234_v24 = vld [vmem:[%s5749_s3 + $0x44] ss:$16 sps:$4 sm:$0xff]  }
  0xa4   :  { %v84_v49 = vadd.f32 %v83_v48, %v82_v47 }
  0xa6   :  { %v86_v51 = vadd.f32 %v85_v50, %v84_v49  ;;  %352 = vmatpush1.bf16.msra.mxu1 %v3523_v27  ;;  %v3606_v27 = vld [vmem:[%s5749_s3 + $0x1b8] sm:$0x11] }
  0xa7   :  { %353 = vmatprep.subr.bf16.mxu1 %v4188_v28  ;;  %v4232_v28 = vld [vmem:[%s5749_s3 + $0x40] ss:$16 sps:$4 sm:$0xff]   ;;  %v3621_v33 = vcombine.low %v3606_v27, %v3606_v27 }
  0xa8   :  { %v88_v53 = vadd.f32 %v87_v52, %v86_v51 }
  0xaa   :  { %v89_v54 = vrot.slane %v88_v53, 4  ;;  %354 = vmatpush1.bf16.msra.mxu1 %v4193_v31  ;;  %v3622_v31 = vcombine.high %v3606_v27, %v3606_v27  ;;  %v4300_v27 = vld [vmem:[%s5749_s3 + $0x204] ss:$16 sps:$4 sm:$0xff]  }
  0xab   :  { %3535 = vmatprep.subr.msk.bf16.mxu1 %vm336_vm2, %v3532_v34 }
  0xac   :  { %v90_v55 = vadd.f32 %v89_v54, %v88_v53 }
  0xae   :  { %v91_v56 = vrot.slane %v90_v55, 2 }
  0xb0   :  { %v92_v57 = vadd.f32 %v91_v56, %v90_v55  ;;  %v4198_v55 = vld [vmem:[%s5749_s3 + $0x78] ss:$16 sps:$4 sm:$0xff]  }
  0xb1   :  { %v4201_v56 = vld [vmem:[%s5749_s3 + $0xe8] ss:$16 sps:$4 sm:$0xff]  }
  0xb2   :  { %v93_v58 = vrot.slane %v92_v57, 1 }
  0xb4   :  { %v94_v59 = vadd.f32 %v93_v58, %v92_v57 }
  0xb6   :  { %v95_v60 = vmul.f32 0.03125, %v94_v59 }
  0xb8   :  { %v96_v61 = vadd.f32 1e-05, %v95_v60 }
  0xba   :  { %4528 = vrsqrt.f32 %v96_v61  ;;  %v4206_v61 = vld [vmem:[%s5749_s3 + $0x9c] ss:$16 sps:$4 sm:$0xff]  }
  0xc4   :  { %v4529_v62 = vpop.eup %4528 }
  0xc5   :  { %v99_v0 = vmul.f32 %v4529_v62, %v75_v40  ;;  %v98_v1 = vmul.f32 %v4529_v62, %v74_v39  ;;  %v100_v3 = vmul.f32 %v4529_v62, %v76_v41  ;;  %v101_v4 = vmul.f32 %v4529_v62, %v77_v42  ;;  %v4203_v41 = vld [vmem:[%s5749_s3 + $0xec] ss:$16 sps:$4 sm:$0xff]   ;;  %v114_v42 = vld [vmem:[%s5747_s1 + $0x4] ss:$0 sm:$0xff] }
  0xc6   :  { %v338_v39 = vsel %vm336_vm2, %v3531_v36, 0  ;;  %v511_v40 = vsel %vm336_vm2, %v3553_v37, 0  ;;  %v4209_v62 = vld [vmem:[%s5749_s3 + $0x10c] ss:$16 sps:$4 sm:$0xff]   ;;  %v4244_v36 = vld [vmem:[%s5749_s3 + $0xe4] ss:$16 sps:$4 sm:$0xff]  }
  0xc7   :  { %v102_v6 = vmul.f32 %v98_v1, %v28_v63  ;;  %v103_v7 = vmul.f32 %v99_v0, %v28_v63  ;;  %v104_v8 = vmul.f32 %v100_v3, %v28_v63  ;;  %v105_v9 = vmul.f32 %v101_v4, %v28_v63  ;;  %356 = vmatpush1.bf16.msra.mxu1 %v338_v39  ;;  %v4204_v63 = vld [vmem:[%s5749_s3 + $0x98] ss:$16 sps:$4 sm:$0xff]   ;;  %v4212_v1 = vld [vmem:[%s5749_s3 + $0xbc] ss:$16 sps:$4 sm:$0xff]   ;;  %v4242_v39 = vld [vmem:[%s5749_s3 + $0xe0] ss:$16 sps:$4 sm:$0xff]  }
  0xc8   :  { %390 = vmatprep.subr.bf16.mxu1 %v4200_v38  ;;  %v4207_v0 = vld [vmem:[%s5749_s3 + $0x108] ss:$16 sps:$4 sm:$0xff]   ;;  %v4215_v3 = vld [vmem:[%s5749_s3 + $0x12c] ss:$16 sps:$4 sm:$0xff]  }
  0xc9   :  { %v106_v10 = vadd.f32 %v102_v6, %v29_v5  ;;  %v107_v11 = vadd.f32 %v103_v7, %v29_v5  ;;  %v108_v12 = vadd.f32 %v104_v8, %v29_v5  ;;  %v109_v16 = vadd.f32 %v105_v9, %v29_v5  ;;  %v3518_v4 = vld [vmem:[%s5749_s3 + $0xd8] sm:$0x11]  ;;  %v3572_v5 = vld [vmem:[%s5749_s3 + $0x148] sm:$0x11] }
  0xca   :  { %v4210_v6 = vld [vmem:[%s5749_s3 + $0xb8] ss:$16 sps:$4 sm:$0xff]   ;;  %v3534_v8 = vcombine.high %v3518_v4, %v3518_v4  ;;  %v3588_v9 = vcombine.high %v3572_v5, %v3572_v5  ;;  %v4247_v37 = vld [vmem:[%s5749_s3 + $0x1cc] ss:$16 sps:$4 sm:$0xff]  }
  0xcb   :  { %v110_v13 = vmax.f32 %v106_v10, 0.0  ;;  %v111_v14 = vmax.f32 %v107_v11, 0.0  ;;  %v112_v17 = vmax.f32 %v108_v12, 0.0  ;;  %v113_v18 = vmax.f32 %v109_v16, 0.0  ;;  %v4213_v7 = vld [vmem:[%s5749_s3 + $0x128] ss:$16 sps:$4 sm:$0xff]  }
  0xcc   :  { %v3533_v10 = vcombine.low %v3518_v4, %v3518_v4  ;;  %v3587_v11 = vcombine.low %v3572_v5, %v3572_v5  ;;  %v4273_v4 = vld [vmem:[%s5749_s3 + $0x258] ss:$16 sps:$4 sm:$0xff]   ;;  %v4278_v5 = vld [vmem:[%s5749_s3 + $0x194] ss:$16 sps:$4 sm:$0xff]  }
  0xcd   :  { %4085 = vmatprep.mubr.msk.f32.mxu0 %vm58_vm1, %v110_v13 }
  0xce   :  { %4086 = vmatmul.mubr.msk.f32.vlgmr.msra.gmra.mrb[0].mxu0 %vm58_vm1, %v111_v14  ;;  %v344_v12 = vsel %vm336_vm2, %v3533_v10, 0  ;;  %v695_v13 = vsel %vm336_vm2, %v3587_v11, 0  ;;  %v4222_v14 = vld [vmem:[%s5749_s3 + $0x4] ss:$16 sps:$4 sm:$0xff]   ;;  %v4279_v10 = vld [vmem:[%s5749_s3 + $0x278] ss:$16 sps:$4 sm:$0xff]  }
  0xcf   :  { %4088 = vmatprep.mubr.msk.f32.mxu0 %vm58_vm1, %v112_v17  ;;  %558 = vmatpush1.bf16.msra.mxu0 %v4180_v15  ;;  %v4225_v15 = vld [vmem:[%s5749_s3 + $0x15c] ss:$16 sps:$4 sm:$0xff]   ;;  %v4220_v17 = vld [vmem:[%s5749_s3] ss:$16 sps:$4 sm:$0xff]  }
  0xd0   :  { %559 = vmatprep.subr.bf16.mxu0 %v4187_v26  ;;  %v244_v26 = vld [vmem:[%s5749_s3 + $0x60] sm:$0x11] }
  0xd1   :  { %v3551_v32 = vcombine.low %v244_v26, %v244_v26 }
  0xd2   :  { %4089 = vmatmul.mubr.msk.f32.gmra.mrb[2].mxu0 %vm58_vm1, %v113_v18  ;;  %v4223_v18 = vld [vmem:[%s5749_s3 + $0x158] ss:$16 sps:$4 sm:$0xff]  }
  0xd3   :  { %589 = vmatprep.mubr.bf16.mxu0 %v4558_v2  ;;  %560 = vmatpush1.bf16.msra.mxu0 %v4185_v25  ;;  %v4237_v25 = vld [vmem:[%s5749_s3 + $0x19c] ss:$16 sps:$4 sm:$0xff]   ;;  %v505_v34 = vsel %vm336_vm2, %v3551_v32, 0  ;;  %v4301_v32 = vld [vmem:[%s5749_s3 + $0x2e8] ss:$16 sps:$4 sm:$0xff]  }
  0xd4   :  { %561 = vmatprep.subr.bf16.mxu0 %v4192_v29  ;;  %v4235_v29 = vld [vmem:[%s5749_s3 + $0x198] ss:$16 sps:$4 sm:$0xff]  }
  0xd7   :  { %562 = vmatpush1.bf16.msra.mxu0 %v4190_v30  ;;  %v3552_v30 = vcombine.high %v244_v26, %v244_v26  ;;  %v4295_v26 = vld [vmem:[%s5749_s3 + $0x2c8] ss:$16 sps:$4 sm:$0xff]  }
  0xd8   :  { %3557 = vmatprep.subr.msk.bf16.mxu0 %vm336_vm2, %v3554_v35  ;;  %v883_v35 = vsel %vm336_vm2, %v3621_v33, 0 }
  0xdb   :  { %564 = vmatpush1.bf16.msra.mxu0 %v511_v40  ;;  %v4245_v40 = vld [vmem:[%s5749_s3 + $0x1c8] ss:$16 sps:$4 sm:$0xff]  }
  0xdc   :  { %741 = vmatprep.subr.bf16.mxu0 %v4203_v41 }
 0x1a1   :  { %v4087_v43 = vpop.f32.mrb[0].mxu0 }
 0x1a2   :  { %v206_v44 = vadd.f32 %v4087_v43, %v114_v42  ;;  %v200_v45 = vpop.f32.mrb[1].mxu0  ;;  %v4253_v43 = vld [vmem:[%s5749_s3 + $0x1ec] ss:$16 sps:$4 sm:$0xff]  }
 0x1a3   :  { %v201_v46 = vadd.f32 %v200_v45, %v114_v42  ;;  %v4251_v45 = vld [vmem:[%s5749_s3 + $0x1e8] ss:$16 sps:$4 sm:$0xff]  }
 0x1a4   :  { %v220_v47 = vmax.f32 %v206_v44, 0.0  ;;  %v4248_v44 = vld [vmem:[%s5749_s3 + $0x100] ss:$16 sps:$4 sm:$0xff]  }
 0x1a5   :  { %v219_v48 = vmax.f32 %v201_v46, 0.0  ;;  %v4090_v49 = vpop.f32.mrb[2].mxu0  ;;  %v4256_v46 = vld [vmem:[%s5749_s3 + $0x124] ss:$16 sps:$4 sm:$0xff]  }
 0x1a6   :  { %225 = vst.msk [vmem:[#allocation2 + $0x8] sm:$0xff] %vm223_vm3, %v220_v47  ;;  %v216_v50 = vadd.f32 %v4090_v49, %v114_v42  ;;  %v210_v51 = vpop.f32.mrb[3].mxu0  ;;  %v4259_v47 = vld [vmem:[%s5749_s3 + $0x20c] ss:$16 sps:$4 sm:$0xff]  }
 0x1a7   :  { %224 = vst.msk [vmem:[#allocation2] sm:$0xff] %vm223_vm3, %v219_v48  ;;  %v211_v52 = vadd.f32 %v210_v51, %v114_v42  ;;  %v4250_v42 = vld [vmem:[%s5749_s3 + $0x104] ss:$16 sps:$4 sm:$0xff]   ;;  %v3640_v49 = vld [vmem:[%s5749_s3 + $0x228] sm:$0x11] }
 0x1a8   :  { %v222_v53 = vmax.f32 %v216_v50, 0.0  ;;  %v3571_v48 = vld [vmem:[%s5749_s3 + $0x140] sm:$0x11]  ;;  %v4257_v51 = vld [vmem:[%s5749_s3 + $0x208] ss:$16 sps:$4 sm:$0xff]  }
 0x1a9   :  { %v221_v54 = vmax.f32 %v211_v52, 0.0  ;;  %v4254_v50 = vld [vmem:[%s5749_s3 + $0x120] ss:$16 sps:$4 sm:$0xff]   ;;  %v3586_v52 = vcombine.high %v3571_v48, %v3571_v48 }
 0x1aa   :  { %227 = vst.msk [vmem:[#allocation2 + $0x18] sm:$0xff] %vm223_vm3, %v222_v53  ;;  %v3656_v53 = vcombine.high %v3640_v49, %v3640_v49 }
 0x1ab   :  { %226 = vst.msk [vmem:[#allocation2 + $0x10] sm:$0xff] %vm223_vm3, %v221_v54  ;;  %v3585_v54 = vcombine.low %v3571_v48, %v3571_v48  ;;  %v4317_v48 = vld [vmem:[%s5749_s3 + $0x338] ss:$16 sps:$4 sm:$0xff]  }
 0x1ae   :  { %v246_v57 = vld [vmem:[#allocation2 + $0x2] sm:$0x3]  ;;  %v230_v58 = vld [vmem:[#allocation2] sm:$0x3]  ;;  %v598_v16 = vld [vmem:[#allocation2 + $0x4] sm:$0x3] }
 0x1af   :  { %v247_v59 = vpack.c.bf16 %v246_v57, %v246_v57  ;;  %v4714_v60 = vpack.c.bf16 %v230_v58, %v230_v58  ;;  %v4767_v19 = vpack.c.bf16 %v598_v16, %v598_v16  ;;  %v786_v38 = vld [vmem:[#allocation2 + $0x6] sm:$0x3] }
 0x1b0   :  { %v4820_v41 = vpack.c.bf16 %v786_v38, %v786_v38  ;;  %v4266_v58 = vld [vmem:[%s5749_s3 + $0x154] ss:$16 sps:$4 sm:$0xff]  }
 0x1b1   :  { %3536 = vmatmul.mubr.msk.bf16.vlgmr.msra.gmra.mrb[0].mxu1 %vm223_vm3, %v247_v59  ;;  %3558 = vmatmul.mubr.msk.bf16.vlgmr.msra.gmra.mrb[4].mxu0 %vm223_vm3, %v4714_v60 }
 0x1b2   :  { %391 = vmatpush1.bf16.msra.mxu1 %v4198_v55  ;;  %742 = vmatpush1.bf16.msra.mxu0 %v4201_v56  ;;  %v3655_v55 = vcombine.low %v3640_v49, %v3640_v49  ;;  %v689_v56 = vsel %vm336_vm2, %v3585_v54, 0  ;;  %v4322_v49 = vld [vmem:[%s5749_s3 + $0x274] ss:$16 sps:$4 sm:$0xff]   ;;  %v4323_v54 = vld [vmem:[%s5749_s3 + $0x358] ss:$16 sps:$4 sm:$0xff]  }
 0x1b3   :  { %392 = vmatprep.subr.bf16.mxu1 %v4206_v61  ;;  %743 = vmatprep.subr.bf16.mxu0 %v4209_v62  ;;  %v4264_v61 = vld [vmem:[%s5749_s3 + $0x150] ss:$16 sps:$4 sm:$0xff]   ;;  %v4267_v62 = vld [vmem:[%s5749_s3 + $0x238] ss:$16 sps:$4 sm:$0xff]  }
 0x1b4   :  { %422 = vmatprep.mubr.bf16.mxu1 %v4558_v2  ;;  %773 = vmatprep.mubr.bf16.mxu0 %v4558_v2  ;;  %v1071_v57 = vsel %vm336_vm2, %v3655_v55, 0 }
 0x1b6   :  { %393 = vmatpush1.bf16.msra.mxu1 %v4204_v63  ;;  %744 = vmatpush1.bf16.msra.mxu0 %v4207_v0  ;;  %v4272_v0 = vld [vmem:[%s5749_s3 + $0x174] ss:$16 sps:$4 sm:$0xff]  }
 0x1b7   :  { %394 = vmatprep.subr.bf16.mxu1 %v4212_v1  ;;  %745 = vmatprep.subr.bf16.mxu0 %v4215_v3  ;;  %v4275_v1 = vld [vmem:[%s5749_s3 + $0x25c] ss:$16 sps:$4 sm:$0xff]   ;;  %v4270_v3 = vld [vmem:[%s5749_s3 + $0x170] ss:$16 sps:$4 sm:$0xff]  }
 0x1ba   :  { %395 = vmatpush1.bf16.msra.mxu1 %v4210_v6  ;;  %746 = vmatpush1.bf16.msra.mxu0 %v4213_v7  ;;  %v4281_v6 = vld [vmem:[%s5749_s3 + $0x27c] ss:$16 sps:$4 sm:$0xff]   ;;  %v3605_v7 = vld [vmem:[%s5749_s3 + $0x1b0] sm:$0x11] }
 0x1bb   :  { %3537 = vmatprep.subr.msk.bf16.mxu1 %vm336_vm2, %v3534_v8  ;;  %3591 = vmatprep.subr.msk.bf16.mxu0 %vm336_vm2, %v3588_v9  ;;  %v3674_v8 = vld [vmem:[%s5749_s3 + $0x298] sm:$0x11]  ;;  %v4276_v9 = vld [vmem:[%s5749_s3 + $0x190] ss:$16 sps:$4 sm:$0xff]   ;;  %v3620_v11 = vcombine.high %v3605_v7, %v3605_v7 }
 0x1be   :  { %397 = vmatpush1.bf16.msra.mxu1 %v344_v12  ;;  %748 = vmatpush1.bf16.msra.mxu0 %v695_v13  ;;  %v3690_v12 = vcombine.high %v3674_v8, %v3674_v8  ;;  %v3619_v13 = vcombine.low %v3605_v7, %v3605_v7  ;;  %v4339_v7 = vld [vmem:[%s5749_s3 + $0x3a8] ss:$16 sps:$4 sm:$0xff]  }
 0x1bf   :  { %516 = vmatprep.subr.bf16.mxu1 %v4222_v14  ;;  %929 = vmatprep.subr.bf16.mxu0 %v4225_v15  ;;  %v3689_v14 = vcombine.low %v3674_v8, %v3674_v8  ;;  %v4344_v8 = vld [vmem:[%s5749_s3 + $0x2e4] ss:$16 sps:$4 sm:$0xff]  }
 0x1c0   :  { %v877_v15 = vsel %vm336_vm2, %v3619_v13, 0  ;;  %v4345_v13 = vld [vmem:[%s5749_s3 + $0x3c8] ss:$16 sps:$4 sm:$0xff]  }
 0x1c1   :  { %3538 = vmatmul.mubr.msk.bf16.vlgmr.msra.gmra.mrb[4].mxu1 %vm223_vm3, %v247_v59  ;;  %3592 = vmatmul.mubr.msk.bf16.vlgmr.msra.gmra.mrb[8].mxu0 %vm223_vm3, %v4767_v19  ;;  %v4269_v59 = vld [vmem:[%s5749_s3 + $0x23c] ss:$16 sps:$4 sm:$0xff]   ;;  %v1259_v16 = vsel %vm336_vm2, %v3689_v14, 0 }
 0x1c2   :  { %517 = vmatpush1.bf16.msra.mxu1 %v4220_v17  ;;  %930 = vmatpush1.bf16.msra.mxu0 %v4223_v18  ;;  %v4288_v17 = vld [vmem:[%s5749_s3 + $0x1c4] ss:$16 sps:$4 sm:$0xff]   ;;  %v4291_v18 = vld [vmem:[%s5749_s3 + $0x2ac] ss:$16 sps:$4 sm:$0xff]  }
 0x1c3   :  { %518 = vmatprep.subr.bf16.mxu1 %v4228_v20  ;;  %931 = vmatprep.subr.bf16.mxu0 %v4231_v21  ;;  %v4286_v20 = vld [vmem:[%s5749_s3 + $0x1c0] ss:$16 sps:$4 sm:$0xff]   ;;  %v4289_v21 = vld [vmem:[%s5749_s3 + $0x2a8] ss:$16 sps:$4 sm:$0xff]  }
 0x1c4   :  { %548 = vmatprep.mubr.bf16.mxu1 %v4558_v2  ;;  %961 = vmatprep.mubr.bf16.mxu0 %v4558_v2 }
 0x1c6   :  { %519 = vmatpush1.bf16.msra.mxu1 %v4226_v22  ;;  %932 = vmatpush1.bf16.msra.mxu0 %v4229_v23  ;;  %v4294_v23 = vld [vmem:[%s5749_s3 + $0x1e4] ss:$16 sps:$4 sm:$0xff]  }
 0x1c7   :  { %520 = vmatprep.subr.bf16.mxu1 %v4234_v24  ;;  %933 = vmatprep.subr.bf16.mxu0 %v4237_v25  ;;  %v4297_v24 = vld [vmem:[%s5749_s3 + $0x2cc] ss:$16 sps:$4 sm:$0xff]   ;;  %v4292_v25 = vld [vmem:[%s5749_s3 + $0x1e0] ss:$16 sps:$4 sm:$0xff]  }
 0x1ca   :  { %521 = vmatpush1.bf16.msra.mxu1 %v4232_v28  ;;  %934 = vmatpush1.bf16.msra.mxu0 %v4235_v29  ;;  %v4303_v28 = vld [vmem:[%s5749_s3 + $0x2ec] ss:$16 sps:$4 sm:$0xff]   ;;  %v3639_v29 = vld [vmem:[%s5749_s3 + $0x220] sm:$0x11] }
 0x1cb   :  { %3555 = vmatprep.subr.msk.bf16.mxu1 %vm336_vm2, %v3552_v30  ;;  %3625 = vmatprep.subr.msk.bf16.mxu0 %vm336_vm2, %v3622_v31  ;;  %v3708_v30 = vld [vmem:[%s5749_s3 + $0x308] sm:$0x11]  ;;  %v4298_v31 = vld [vmem:[%s5749_s3 + $0x200] ss:$16 sps:$4 sm:$0xff]   ;;  %v3654_v33 = vcombine.high %v3639_v29, %v3639_v29 }
 0x1ce   :  { %523 = vmatpush1.bf16.msra.mxu1 %v505_v34  ;;  %936 = vmatpush1.bf16.msra.mxu0 %v883_v35  ;;  %v3724_v34 = vcombine.high %v3708_v30, %v3708_v30  ;;  %v3653_v35 = vcombine.low %v3639_v29, %v3639_v29  ;;  %v4361_v29 = vld [vmem:[%s5749_s3 + $0x418] ss:$16 sps:$4 sm:$0xff]  }
 0x1cf   :  { %700 = vmatprep.subr.bf16.mxu1 %v4244_v36  ;;  %1117 = vmatprep.subr.bf16.mxu0 %v4247_v37  ;;  %v3723_v36 = vcombine.low %v3708_v30, %v3708_v30  ;;  %v4366_v30 = vld [vmem:[%s5749_s3 + $0x354] ss:$16 sps:$4 sm:$0xff]  }
 0x1d0   :  { %v1065_v37 = vsel %vm336_vm2, %v3653_v35, 0  ;;  %v4367_v35 = vld [vmem:[%s5749_s3 + $0x438] ss:$16 sps:$4 sm:$0xff]  }
 0x1d1   :  { %3556 = vmatmul.mubr.msk.bf16.vlgmr.msra.gmra.mrb[8].mxu1 %vm223_vm3, %v4714_v60  ;;  %3626 = vmatmul.mubr.msk.bf16.vlgmr.msra.gmra.mrb[12].mxu0 %vm223_vm3, %v4820_v41  ;;  %v974_v60 = vld [vmem:[#allocation2 + $0x8] sm:$0x3]  ;;  %v1447_v38 = vsel %vm336_vm2, %v3723_v36, 0 }
 0x1d2   :  { %701 = vmatpush1.bf16.msra.mxu1 %v4242_v39  ;;  %1118 = vmatpush1.bf16.msra.mxu0 %v4245_v40  ;;  %v4874_v63 = vpack.c.bf16 %v974_v60, %v974_v60  ;;  %v4310_v39 = vld [vmem:[%s5749_s3 + $0x234] ss:$16 sps:$4 sm:$0xff]   ;;  %v4313_v40 = vld [vmem:[%s5749_s3 + $0x31c] ss:$16 sps:$4 sm:$0xff]  }
 0x1d3   :  { %702 = vmatprep.subr.bf16.mxu1 %v4250_v42  ;;  %1119 = vmatprep.subr.bf16.mxu0 %v4253_v43  ;;  %v4308_v42 = vld [vmem:[%s5749_s3 + $0x230] ss:$16 sps:$4 sm:$0xff]   ;;  %v4311_v43 = vld [vmem:[%s5749_s3 + $0x318] ss:$16 sps:$4 sm:$0xff]  }
 0x1d4   :  { %732 = vmatprep.mubr.bf16.mxu1 %v4558_v2  ;;  %1149 = vmatprep.mubr.bf16.mxu0 %v4558_v2 }
 0x1d6   :  { %703 = vmatpush1.bf16.msra.mxu1 %v4248_v44  ;;  %1120 = vmatpush1.bf16.msra.mxu0 %v4251_v45  ;;  %v4316_v45 = vld [vmem:[%s5749_s3 + $0x254] ss:$16 sps:$4 sm:$0xff]  }
 0x1d7   :  { %704 = vmatprep.subr.bf16.mxu1 %v4256_v46  ;;  %1121 = vmatprep.subr.bf16.mxu0 %v4259_v47  ;;  %v4319_v46 = vld [vmem:[%s5749_s3 + $0x33c] ss:$16 sps:$4 sm:$0xff]   ;;  %v4314_v47 = vld [vmem:[%s5749_s3 + $0x250] ss:$16 sps:$4 sm:$0xff]  }
 0x1da   :  { %705 = vmatpush1.bf16.msra.mxu1 %v4254_v50  ;;  %1122 = vmatpush1.bf16.msra.mxu0 %v4257_v51  ;;  %v4325_v50 = vld [vmem:[%s5749_s3 + $0x35c] ss:$16 sps:$4 sm:$0xff]   ;;  %v3673_v51 = vld [vmem:[%s5749_s3 + $0x290] sm:$0x11] }
 0x1db   :  { %3589 = vmatprep.subr.msk.bf16.mxu1 %vm336_vm2, %v3586_v52  ;;  %3659 = vmatprep.subr.msk.bf16.mxu0 %vm336_vm2, %v3656_v53  ;;  %v3742_v52 = vld [vmem:[%s5749_s3 + $0x378] sm:$0x11]  ;;  %v4320_v53 = vld [vmem:[%s5749_s3 + $0x270] ss:$16 sps:$4 sm:$0xff]   ;;  %v3688_v55 = vcombine.high %v3673_v51, %v3673_v51 }
 0x1de   :  { %707 = vmatpush1.bf16.msra.mxu1 %v689_v56  ;;  %1124 = vmatpush1.bf16.msra.mxu0 %v1071_v57  ;;  %v3758_v56 = vcombine.high %v3742_v52, %v3742_v52  ;;  %v3687_v57 = vcombine.low %v3673_v51, %v3673_v51  ;;  %v4383_v51 = vld [vmem:[%s5749_s3 + $0x488] ss:$16 sps:$4 sm:$0xff]  }
 0x1df   :  { %888 = vmatprep.subr.bf16.mxu1 %v4266_v58  ;;  %1305 = vmatprep.subr.bf16.mxu0 %v4269_v59  ;;  %v3757_v58 = vcombine.low %v3742_v52, %v3742_v52  ;;  %v4388_v52 = vld [vmem:[%s5749_s3 + $0x3c4] ss:$16 sps:$4 sm:$0xff]  }
 0x1e0   :  { %v1253_v59 = vsel %vm336_vm2, %v3687_v57, 0  ;;  %v4389_v57 = vld [vmem:[%s5749_s3 + $0x4a8] ss:$16 sps:$4 sm:$0xff]  }
 0x1e1   :  { %3590 = vmatmul.mubr.msk.bf16.vlgmr.msra.gmra.mrb[12].mxu1 %vm223_vm3, %v4767_v19  ;;  %3660 = vmatmul.mubr.msk.bf16.vlgmr.msra.gmra.mrb[16].mxu0 %vm223_vm3, %v4874_v63  ;;  %v1162_v19 = vld [vmem:[#allocation2 + $0xa] sm:$0x3]  ;;  %v1635_v60 = vsel %vm336_vm2, %v3757_v58, 0 }
 0x1e2   :  { %889 = vmatpush1.bf16.msra.mxu1 %v4264_v61  ;;  %1306 = vmatpush1.bf16.msra.mxu0 %v4267_v62  ;;  %v4928_v22 = vpack.c.bf16 %v1162_v19, %v1162_v19  ;;  %v4332_v61 = vld [vmem:[%s5749_s3 + $0x2a4] ss:$16 sps:$4 sm:$0xff]   ;;  %v4335_v62 = vld [vmem:[%s5749_s3 + $0x38c] ss:$16 sps:$4 sm:$0xff]  }
 0x1e3   :  { %890 = vmatprep.subr.bf16.mxu1 %v4272_v0  ;;  %1307 = vmatprep.subr.bf16.mxu0 %v4275_v1  ;;  %v4330_v0 = vld [vmem:[%s5749_s3 + $0x2a0] ss:$16 sps:$4 sm:$0xff]   ;;  %v4333_v1 = vld [vmem:[%s5749_s3 + $0x388] ss:$16 sps:$4 sm:$0xff]  }
 0x1e4   :  { %920 = vmatprep.mubr.bf16.mxu1 %v4558_v2  ;;  %1337 = vmatprep.mubr.bf16.mxu0 %v4558_v2 }
 0x1e6   :  { %891 = vmatpush1.bf16.msra.mxu1 %v4270_v3  ;;  %1308 = vmatpush1.bf16.msra.mxu0 %v4273_v4  ;;  %v4338_v4 = vld [vmem:[%s5749_s3 + $0x2c4] ss:$16 sps:$4 sm:$0xff]  }
 0x1e7   :  { %892 = vmatprep.subr.bf16.mxu1 %v4278_v5  ;;  %1309 = vmatprep.subr.bf16.mxu0 %v4281_v6  ;;  %v4341_v5 = vld [vmem:[%s5749_s3 + $0x3ac] ss:$16 sps:$4 sm:$0xff]   ;;  %v4336_v6 = vld [vmem:[%s5749_s3 + $0x2c0] ss:$16 sps:$4 sm:$0xff]  }
 0x1ea   :  { %893 = vmatpush1.bf16.msra.mxu1 %v4276_v9  ;;  %1310 = vmatpush1.bf16.msra.mxu0 %v4279_v10  ;;  %v4347_v9 = vld [vmem:[%s5749_s3 + $0x3cc] ss:$16 sps:$4 sm:$0xff]   ;;  %v3707_v10 = vld [vmem:[%s5749_s3 + $0x300] sm:$0x11] }
 0x1eb   :  { %3623 = vmatprep.subr.msk.bf16.mxu1 %vm336_vm2, %v3620_v11  ;;  %3693 = vmatprep.subr.msk.bf16.mxu0 %vm336_vm2, %v3690_v12  ;;  %v3776_v11 = vld [vmem:[%s5749_s3 + $0x3e8] sm:$0x11]  ;;  %v4342_v12 = vld [vmem:[%s5749_s3 + $0x2e0] ss:$16 sps:$4 sm:$0xff]   ;;  %v3722_v14 = vcombine.high %v3707_v10, %v3707_v10 }
 0x1ee   :  { %895 = vmatpush1.bf16.msra.mxu1 %v877_v15  ;;  %1312 = vmatpush1.bf16.msra.mxu0 %v1259_v16  ;;  %v3792_v15 = vcombine.high %v3776_v11, %v3776_v11  ;;  %v3721_v16 = vcombine.low %v3707_v10, %v3707_v10  ;;  %v4405_v10 = vld [vmem:[%s5749_s3 + $0x4f8] ss:$16 sps:$4 sm:$0xff]  }
 0x1ef   :  { %1076 = vmatprep.subr.bf16.mxu1 %v4288_v17  ;;  %1493 = vmatprep.subr.bf16.mxu0 %v4291_v18  ;;  %v3791_v17 = vcombine.low %v3776_v11, %v3776_v11  ;;  %v4410_v11 = vld [vmem:[%s5749_s3 + $0x434] ss:$16 sps:$4 sm:$0xff]  }
 0x1f0   :  { %v1441_v18 = vsel %vm336_vm2, %v3721_v16, 0  ;;  %v4411_v16 = vld [vmem:[%s5749_s3 + $0x518] ss:$16 sps:$4 sm:$0xff]  }
 0x1f1   :  { %3624 = vmatmul.mubr.msk.bf16.vlgmr.msra.gmra.mrb[16].mxu1 %vm223_vm3, %v4820_v41  ;;  %3694 = vmatmul.mubr.msk.bf16.vlgmr.msra.gmra.mrb[20].mxu0 %vm223_vm3, %v4928_v22  ;;  %v1350_v41 = vld [vmem:[#allocation2 + $0xc] sm:$0x3]  ;;  %v1823_v19 = vsel %vm336_vm2, %v3791_v17, 0 }
 0x1f2   :  { %1077 = vmatpush1.bf16.msra.mxu1 %v4286_v20  ;;  %1494 = vmatpush1.bf16.msra.mxu0 %v4289_v21  ;;  %v4982_v44 = vpack.c.bf16 %v1350_v41, %v1350_v41  ;;  %v4354_v20 = vld [vmem:[%s5749_s3 + $0x314] ss:$16 sps:$4 sm:$0xff]   ;;  %v4357_v21 = vld [vmem:[%s5749_s3 + $0x3fc] ss:$16 sps:$4 sm:$0xff]  }
 0x1f3   :  { %1078 = vmatprep.subr.bf16.mxu1 %v4294_v23  ;;  %1495 = vmatprep.subr.bf16.mxu0 %v4297_v24  ;;  %v4352_v23 = vld [vmem:[%s5749_s3 + $0x310] ss:$16 sps:$4 sm:$0xff]   ;;  %v4355_v24 = vld [vmem:[%s5749_s3 + $0x3f8] ss:$16 sps:$4 sm:$0xff]  }
 0x1f4   :  { %1108 = vmatprep.mubr.bf16.mxu1 %v4558_v2  ;;  %1525 = vmatprep.mubr.bf16.mxu0 %v4558_v2 }
 0x1f6   :  { %1079 = vmatpush1.bf16.msra.mxu1 %v4292_v25  ;;  %1496 = vmatpush1.bf16.msra.mxu0 %v4295_v26  ;;  %v4360_v26 = vld [vmem:[%s5749_s3 + $0x334] ss:$16 sps:$4 sm:$0xff]  }
 0x1f7   :  { %1080 = vmatprep.subr.bf16.mxu1 %v4300_v27  ;;  %1497 = vmatprep.subr.bf16.mxu0 %v4303_v28  ;;  %v4363_v27 = vld [vmem:[%s5749_s3 + $0x41c] ss:$16 sps:$4 sm:$0xff]   ;;  %v4358_v28 = vld [vmem:[%s5749_s3 + $0x330] ss:$16 sps:$4 sm:$0xff]  }
 0x1fa   :  { %1081 = vmatpush1.bf16.msra.mxu1 %v4298_v31  ;;  %1498 = vmatpush1.bf16.msra.mxu0 %v4301_v32  ;;  %v4369_v31 = vld [vmem:[%s5749_s3 + $0x43c] ss:$16 sps:$4 sm:$0xff]   ;;  %v3741_v32 = vld [vmem:[%s5749_s3 + $0x370] sm:$0x11] }
 0x1fb   :  { %3657 = vmatprep.subr.msk.bf16.mxu1 %vm336_vm2, %v3654_v33  ;;  %3727 = vmatprep.subr.msk.bf16.mxu0 %vm336_vm2, %v3724_v34  ;;  %v3810_v33 = vld [vmem:[%s5749_s3 + $0x458] sm:$0x11]  ;;  %v4364_v34 = vld [vmem:[%s5749_s3 + $0x350] ss:$16 sps:$4 sm:$0xff]   ;;  %v3756_v36 = vcombine.high %v3741_v32, %v3741_v32 }
 0x1fe   :  { %1083 = vmatpush1.bf16.msra.mxu1 %v1065_v37  ;;  %1500 = vmatpush1.bf16.msra.mxu0 %v1447_v38  ;;  %v3826_v37 = vcombine.high %v3810_v33, %v3810_v33  ;;  %v3755_v38 = vcombine.low %v3741_v32, %v3741_v32  ;;  %v4427_v32 = vld [vmem:[%s5749_s3 + $0x568] ss:$16 sps:$4 sm:$0xff]  }
 0x1ff   :  { %1264 = vmatprep.subr.bf16.mxu1 %v4310_v39  ;;  %1681 = vmatprep.subr.bf16.mxu0 %v4313_v40  ;;  %v3825_v39 = vcombine.low %v3810_v33, %v3810_v33  ;;  %v4432_v33 = vld [vmem:[%s5749_s3 + $0x4a4] ss:$16 sps:$4 sm:$0xff]  }
 0x200   :  { %v1629_v40 = vsel %vm336_vm2, %v3755_v38, 0  ;;  %v4433_v38 = vld [vmem:[%s5749_s3 + $0x588] ss:$16 sps:$4 sm:$0xff]  }
 0x201   :  { %3658 = vmatmul.mubr.msk.bf16.vlgmr.msra.gmra.mrb[20].mxu1 %vm223_vm3, %v4874_v63  ;;  %3728 = vmatmul.mubr.msk.bf16.vlgmr.msra.gmra.mrb[24].mxu0 %vm223_vm3, %v4982_v44  ;;  %v1538_v63 = vld [vmem:[#allocation2 + $0xe] sm:$0x3]  ;;  %v2011_v41 = vsel %vm336_vm2, %v3825_v39, 0 }
 0x202   :  { %1265 = vmatpush1.bf16.msra.mxu1 %v4308_v42  ;;  %1682 = vmatpush1.bf16.msra.mxu0 %v4311_v43  ;;  %v5036_v3 = vpack.c.bf16 %v1538_v63, %v1538_v63  ;;  %v4376_v42 = vld [vmem:[%s5749_s3 + $0x384] ss:$16 sps:$4 sm:$0xff]   ;;  %v4379_v43 = vld [vmem:[%s5749_s3 + $0x46c] ss:$16 sps:$4 sm:$0xff]  }
 0x203   :  { %1266 = vmatprep.subr.bf16.mxu1 %v4316_v45  ;;  %1683 = vmatprep.subr.bf16.mxu0 %v4319_v46  ;;  %v4374_v45 = vld [vmem:[%s5749_s3 + $0x380] ss:$16 sps:$4 sm:$0xff]   ;;  %v4377_v46 = vld [vmem:[%s5749_s3 + $0x468] ss:$16 sps:$4 sm:$0xff]  }
 0x204   :  { %1296 = vmatprep.mubr.bf16.mxu1 %v4558_v2  ;;  %1713 = vmatprep.mubr.bf16.mxu0 %v4558_v2 }
 0x206   :  { %1267 = vmatpush1.bf16.msra.mxu1 %v4314_v47  ;;  %1684 = vmatpush1.bf16.msra.mxu0 %v4317_v48  ;;  %v4382_v48 = vld [vmem:[%s5749_s3 + $0x3a4] ss:$16 sps:$4 sm:$0xff]  }
 0x207   :  { %1268 = vmatprep.subr.bf16.mxu1 %v4322_v49  ;;  %1685 = vmatprep.subr.bf16.mxu0 %v4325_v50  ;;  %v4385_v49 = vld [vmem:[%s5749_s3 + $0x48c] ss:$16 sps:$4 sm:$0xff]   ;;  %v4380_v50 = vld [vmem:[%s5749_s3 + $0x3a0] ss:$16 sps:$4 sm:$0xff]  }
 0x20a   :  { %1269 = vmatpush1.bf16.msra.mxu1 %v4320_v53  ;;  %1686 = vmatpush1.bf16.msra.mxu0 %v4323_v54  ;;  %v4391_v53 = vld [vmem:[%s5749_s3 + $0x4ac] ss:$16 sps:$4 sm:$0xff]   ;;  %v3775_v54 = vld [vmem:[%s5749_s3 + $0x3e0] sm:$0x11] }
 0x20b   :  { %3691 = vmatprep.subr.msk.bf16.mxu1 %vm336_vm2, %v3688_v55  ;;  %3761 = vmatprep.subr.msk.bf16.mxu0 %vm336_vm2, %v3758_v56  ;;  %v3844_v55 = vld [vmem:[%s5749_s3 + $0x4c8] sm:$0x11]  ;;  %v4386_v56 = vld [vmem:[%s5749_s3 + $0x3c0] ss:$16 sps:$4 sm:$0xff]   ;;  %v3790_v58 = vcombine.high %v3775_v54, %v3775_v54 }
 0x20e   :  { %1271 = vmatpush1.bf16.msra.mxu1 %v1253_v59  ;;  %1688 = vmatpush1.bf16.msra.mxu0 %v1635_v60  ;;  %v3860_v59 = vcombine.high %v3844_v55, %v3844_v55  ;;  %v3789_v60 = vcombine.low %v3775_v54, %v3775_v54  ;;  %v4449_v54 = vld [vmem:[%s5749_s3 + $0x5d8] ss:$16 sps:$4 sm:$0xff]  }
 0x20f   :  { %1452 = vmatprep.subr.bf16.mxu1 %v4332_v61  ;;  %1869 = vmatprep.subr.bf16.mxu0 %v4335_v62  ;;  %v3859_v61 = vcombine.low %v3844_v55, %v3844_v55  ;;  %v4454_v55 = vld [vmem:[%s5749_s3 + $0x514] ss:$16 sps:$4 sm:$0xff]  }
 0x210   :  { %v1817_v62 = vsel %vm336_vm2, %v3789_v60, 0  ;;  %v4455_v60 = vld [vmem:[%s5749_s3 + $0x5f8] ss:$16 sps:$4 sm:$0xff]  }
 0x211   :  { %3692 = vmatmul.mubr.msk.bf16.vlgmr.msra.gmra.mrb[24].mxu1 %vm223_vm3, %v4928_v22  ;;  %3762 = vmatmul.mubr.msk.bf16.vlgmr.msra.gmra.mrb[28].mxu0 %vm223_vm3, %v5036_v3  ;;  %v1726_v22 = vld [vmem:[#allocation2 + $0x10] sm:$0x3]  ;;  %v2199_v63 = vsel %vm336_vm2, %v3859_v61, 0 }
 0x212   :  { %1453 = vmatpush1.bf16.msra.mxu1 %v4330_v0  ;;  %1870 = vmatpush1.bf16.msra.mxu0 %v4333_v1  ;;  %v5090_v25 = vpack.c.bf16 %v1726_v22, %v1726_v22  ;;  %v4398_v0 = vld [vmem:[%s5749_s3 + $0x3f4] ss:$16 sps:$4 sm:$0xff]   ;;  %v4401_v1 = vld [vmem:[%s5749_s3 + $0x4dc] ss:$16 sps:$4 sm:$0xff]  }
 0x213   :  { %1454 = vmatprep.subr.bf16.mxu1 %v4338_v4  ;;  %1871 = vmatprep.subr.bf16.mxu0 %v4341_v5  ;;  %v4396_v4 = vld [vmem:[%s5749_s3 + $0x3f0] ss:$16 sps:$4 sm:$0xff]   ;;  %v4399_v5 = vld [vmem:[%s5749_s3 + $0x4d8] ss:$16 sps:$4 sm:$0xff]  }
 0x214   :  { %1484 = vmatprep.mubr.bf16.mxu1 %v4558_v2  ;;  %1901 = vmatprep.mubr.bf16.mxu0 %v4558_v2 }
 0x216   :  { %1455 = vmatpush1.bf16.msra.mxu1 %v4336_v6  ;;  %1872 = vmatpush1.bf16.msra.mxu0 %v4339_v7  ;;  %v4404_v7 = vld [vmem:[%s5749_s3 + $0x414] ss:$16 sps:$4 sm:$0xff]  }
 0x217   :  { %1456 = vmatprep.subr.bf16.mxu1 %v4344_v8  ;;  %1873 = vmatprep.subr.bf16.mxu0 %v4347_v9  ;;  %v4407_v8 = vld [vmem:[%s5749_s3 + $0x4fc] ss:$16 sps:$4 sm:$0xff]   ;;  %v4402_v9 = vld [vmem:[%s5749_s3 + $0x410] ss:$16 sps:$4 sm:$0xff]  }
 0x21a   :  { %1457 = vmatpush1.bf16.msra.mxu1 %v4342_v12  ;;  %1874 = vmatpush1.bf16.msra.mxu0 %v4345_v13  ;;  %v4413_v12 = vld [vmem:[%s5749_s3 + $0x51c] ss:$16 sps:$4 sm:$0xff]   ;;  %v3809_v13 = vld [vmem:[%s5749_s3 + $0x450] sm:$0x11] }
 0x21b   :  { %3725 = vmatprep.subr.msk.bf16.mxu1 %vm336_vm2, %v3722_v14  ;;  %3795 = vmatprep.subr.msk.bf16.mxu0 %vm336_vm2, %v3792_v15  ;;  %v3878_v14 = vld [vmem:[%s5749_s3 + $0x538] sm:$0x11]  ;;  %v4408_v15 = vld [vmem:[%s5749_s3 + $0x430] ss:$16 sps:$4 sm:$0xff]   ;;  %v3824_v17 = vcombine.high %v3809_v13, %v3809_v13 }
 0x21e   :  { %1459 = vmatpush1.bf16.msra.mxu1 %v1441_v18  ;;  %1876 = vmatpush1.bf16.msra.mxu0 %v1823_v19  ;;  %v3894_v18 = vcombine.high %v3878_v14, %v3878_v14  ;;  %v3823_v19 = vcombine.low %v3809_v13, %v3809_v13  ;;  %v4471_v13 = vld [vmem:[%s5749_s3 + $0x648] ss:$16 sps:$4 sm:$0xff]  }
 0x21f   :  { %1640 = vmatprep.subr.bf16.mxu1 %v4354_v20  ;;  %2057 = vmatprep.subr.bf16.mxu0 %v4357_v21  ;;  %v3893_v20 = vcombine.low %v3878_v14, %v3878_v14  ;;  %v4476_v14 = vld [vmem:[%s5749_s3 + $0x584] ss:$16 sps:$4 sm:$0xff]  }
 0x220   :  { %v2005_v21 = vsel %vm336_vm2, %v3823_v19, 0  ;;  %v4477_v19 = vld [vmem:[%s5749_s3 + $0x668] ss:$16 sps:$4 sm:$0xff]  }
 0x221   :  { %3726 = vmatmul.mubr.msk.bf16.vlgmr.msra.gmra.mrb[28].mxu1 %vm223_vm3, %v4982_v44  ;;  %3796 = vmatmul.mubr.msk.bf16.vlgmr.msra.gmra.mrb[32].mxu0 %vm223_vm3, %v5090_v25  ;;  %v1914_v44 = vld [vmem:[#allocation2 + $0x12] sm:$0x3]  ;;  %v2387_v22 = vsel %vm336_vm2, %v3893_v20, 0 }
 0x222   :  { %1641 = vmatpush1.bf16.msra.mxu1 %v4352_v23  ;;  %2058 = vmatpush1.bf16.msra.mxu0 %v4355_v24  ;;  %v5144_v47 = vpack.c.bf16 %v1914_v44, %v1914_v44  ;;  %v4420_v23 = vld [vmem:[%s5749_s3 + $0x464] ss:$16 sps:$4 sm:$0xff]   ;;  %v4423_v24 = vld [vmem:[%s5749_s3 + $0x54c] ss:$16 sps:$4 sm:$0xff]  }
 0x223   :  { %1642 = vmatprep.subr.bf16.mxu1 %v4360_v26  ;;  %2059 = vmatprep.subr.bf16.mxu0 %v4363_v27  ;;  %v4418_v26 = vld [vmem:[%s5749_s3 + $0x460] ss:$16 sps:$4 sm:$0xff]   ;;  %v4421_v27 = vld [vmem:[%s5749_s3 + $0x548] ss:$16 sps:$4 sm:$0xff]  }
 0x224   :  { %1672 = vmatprep.mubr.bf16.mxu1 %v4558_v2  ;;  %2089 = vmatprep.mubr.bf16.mxu0 %v4558_v2 }
 0x226   :  { %1643 = vmatpush1.bf16.msra.mxu1 %v4358_v28  ;;  %2060 = vmatpush1.bf16.msra.mxu0 %v4361_v29  ;;  %v4426_v29 = vld [vmem:[%s5749_s3 + $0x484] ss:$16 sps:$4 sm:$0xff]  }
 0x227   :  { %1644 = vmatprep.subr.bf16.mxu1 %v4366_v30  ;;  %2061 = vmatprep.subr.bf16.mxu0 %v4369_v31  ;;  %v4429_v30 = vld [vmem:[%s5749_s3 + $0x56c] ss:$16 sps:$4 sm:$0xff]   ;;  %v4424_v31 = vld [vmem:[%s5749_s3 + $0x480] ss:$16 sps:$4 sm:$0xff]  }
 0x22a   :  { %1645 = vmatpush1.bf16.msra.mxu1 %v4364_v34  ;;  %2062 = vmatpush1.bf16.msra.mxu0 %v4367_v35  ;;  %v4435_v34 = vld [vmem:[%s5749_s3 + $0x58c] ss:$16 sps:$4 sm:$0xff]   ;;  %v3843_v35 = vld [vmem:[%s5749_s3 + $0x4c0] sm:$0x11] }
 0x22b   :  { %3759 = vmatprep.subr.msk.bf16.mxu1 %vm336_vm2, %v3756_v36  ;;  %3829 = vmatprep.subr.msk.bf16.mxu0 %vm336_vm2, %v3826_v37  ;;  %v3912_v36 = vld [vmem:[%s5749_s3 + $0x5a8] sm:$0x11]  ;;  %v4430_v37 = vld [vmem:[%s5749_s3 + $0x4a0] ss:$16 sps:$4 sm:$0xff]   ;;  %v3858_v39 = vcombine.high %v3843_v35, %v3843_v35 }
 0x22e   :  { %1647 = vmatpush1.bf16.msra.mxu1 %v1629_v40  ;;  %2064 = vmatpush1.bf16.msra.mxu0 %v2011_v41  ;;  %v3928_v40 = vcombine.high %v3912_v36, %v3912_v36  ;;  %v3857_v41 = vcombine.low %v3843_v35, %v3843_v35  ;;  %v4493_v35 = vld [vmem:[%s5749_s3 + $0x6b8] ss:$16 sps:$4 sm:$0xff]  }
 0x22f   :  { %1828 = vmatprep.subr.bf16.mxu1 %v4376_v42  ;;  %2245 = vmatprep.subr.bf16.mxu0 %v4379_v43  ;;  %v3927_v42 = vcombine.low %v3912_v36, %v3912_v36  ;;  %v4498_v36 = vld [vmem:[%s5749_s3 + $0x5f4] ss:$16 sps:$4 sm:$0xff]  }
 0x230   :  { %v2193_v43 = vsel %vm336_vm2, %v3857_v41, 0  ;;  %v4014_v41 = vld [vmem:[%s5749_s3 + $0x6f8] sm:$0x11] }
 0x231   :  { %3760 = vmatmul.mubr.msk.bf16.vlgmr.msra.gmra.mrb[32].mxu1 %vm223_vm3, %v5036_v3  ;;  %3830 = vmatmul.mubr.msk.bf16.vlgmr.msra.gmra.mrb[36].mxu0 %vm223_vm3, %v5144_v47  ;;  %v2102_v3 = vld [vmem:[#allocation2 + $0x14] sm:$0x3]  ;;  %v2575_v44 = vsel %vm336_vm2, %v3927_v42, 0 }
 0x232   :  { %1829 = vmatpush1.bf16.msra.mxu1 %v4374_v45  ;;  %2246 = vmatpush1.bf16.msra.mxu0 %v4377_v46  ;;  %v5198_v6 = vpack.c.bf16 %v2102_v3, %v2102_v3  ;;  %v4442_v45 = vld [vmem:[%s5749_s3 + $0x4d4] ss:$16 sps:$4 sm:$0xff]   ;;  %v4445_v46 = vld [vmem:[%s5749_s3 + $0x5bc] ss:$16 sps:$4 sm:$0xff]  }
 0x233   :  { %1830 = vmatprep.subr.bf16.mxu1 %v4382_v48  ;;  %2247 = vmatprep.subr.bf16.mxu0 %v4385_v49  ;;  %v4440_v48 = vld [vmem:[%s5749_s3 + $0x4d0] ss:$16 sps:$4 sm:$0xff]   ;;  %v4443_v49 = vld [vmem:[%s5749_s3 + $0x5b8] ss:$16 sps:$4 sm:$0xff]  }
 0x234   :  { %1860 = vmatprep.mubr.bf16.mxu1 %v4558_v2  ;;  %2277 = vmatprep.mubr.bf16.mxu0 %v4558_v2 }
 0x236   :  { %1831 = vmatpush1.bf16.msra.mxu1 %v4380_v50  ;;  %2248 = vmatpush1.bf16.msra.mxu0 %v4383_v51  ;;  %v4448_v51 = vld [vmem:[%s5749_s3 + $0x4f4] ss:$16 sps:$4 sm:$0xff]  }
 0x237   :  { %1832 = vmatprep.subr.bf16.mxu1 %v4388_v52  ;;  %2249 = vmatprep.subr.bf16.mxu0 %v4391_v53  ;;  %v4451_v52 = vld [vmem:[%s5749_s3 + $0x5dc] ss:$16 sps:$4 sm:$0xff]   ;;  %v4446_v53 = vld [vmem:[%s5749_s3 + $0x4f0] ss:$16 sps:$4 sm:$0xff]  }
 0x23a   :  { %1833 = vmatpush1.bf16.msra.mxu1 %v4386_v56  ;;  %2250 = vmatpush1.bf16.msra.mxu0 %v4389_v57  ;;  %v4457_v56 = vld [vmem:[%s5749_s3 + $0x5fc] ss:$16 sps:$4 sm:$0xff]   ;;  %v3877_v57 = vld [vmem:[%s5749_s3 + $0x530] sm:$0x11] }
 0x23b   :  { %3793 = vmatprep.subr.msk.bf16.mxu1 %vm336_vm2, %v3790_v58  ;;  %3863 = vmatprep.subr.msk.bf16.mxu0 %vm336_vm2, %v3860_v59  ;;  %v3946_v58 = vld [vmem:[%s5749_s3 + $0x618] sm:$0x11]  ;;  %v4452_v59 = vld [vmem:[%s5749_s3 + $0x510] ss:$16 sps:$4 sm:$0xff]   ;;  %v3892_v61 = vcombine.high %v3877_v57, %v3877_v57 }
 0x23e   :  { %1835 = vmatpush1.bf16.msra.mxu1 %v1817_v62  ;;  %2252 = vmatpush1.bf16.msra.mxu0 %v2199_v63  ;;  %v3962_v62 = vcombine.high %v3946_v58, %v3946_v58  ;;  %v3891_v63 = vcombine.low %v3877_v57, %v3877_v57  ;;  %v3042_v57 = vld [vmem:[#allocation2 + $0x1e] sm:$0x3] }
 0x23f   :  { %2016 = vmatprep.subr.bf16.mxu1 %v4398_v0  ;;  %2433 = vmatprep.subr.bf16.mxu0 %v4401_v1  ;;  %v3961_v0 = vcombine.low %v3946_v58, %v3946_v58  ;;  %v4506_v58 = vld [vmem:[%s5749_s3 + $0x620] ss:$16 sps:$4 sm:$0xff]  }
 0x240   :  { %v2381_v1 = vsel %vm336_vm2, %v3891_v63, 0 }
 0x241   :  { %3794 = vmatmul.mubr.msk.bf16.vlgmr.msra.gmra.mrb[36].mxu1 %vm223_vm3, %v5090_v25  ;;  %3864 = vmatmul.mubr.msk.bf16.vlgmr.msra.gmra.mrb[40].mxu0 %vm223_vm3, %v5198_v6  ;;  %v2290_v25 = vld [vmem:[#allocation2 + $0x16] sm:$0x3]  ;;  %v2763_v3 = vsel %vm336_vm2, %v3961_v0, 0 }
 0x242   :  { %2017 = vmatpush1.bf16.msra.mxu1 %v4396_v4  ;;  %2434 = vmatpush1.bf16.msra.mxu0 %v4399_v5  ;;  %v5252_v28 = vpack.c.bf16 %v2290_v25, %v2290_v25  ;;  %v4464_v4 = vld [vmem:[%s5749_s3 + $0x544] ss:$16 sps:$4 sm:$0xff]   ;;  %v4467_v5 = vld [vmem:[%s5749_s3 + $0x62c] ss:$16 sps:$4 sm:$0xff]  }
 0x243   :  { %2018 = vmatprep.subr.bf16.mxu1 %v4404_v7  ;;  %2435 = vmatprep.subr.bf16.mxu0 %v4407_v8  ;;  %v4462_v7 = vld [vmem:[%s5749_s3 + $0x540] ss:$16 sps:$4 sm:$0xff]   ;;  %v4465_v8 = vld [vmem:[%s5749_s3 + $0x628] ss:$16 sps:$4 sm:$0xff]  }
 0x244   :  { %2048 = vmatprep.mubr.bf16.mxu1 %v4558_v2  ;;  %2465 = vmatprep.mubr.bf16.mxu0 %v4558_v2 }
 0x246   :  { %2019 = vmatpush1.bf16.msra.mxu1 %v4402_v9  ;;  %2436 = vmatpush1.bf16.msra.mxu0 %v4405_v10  ;;  %v4470_v10 = vld [vmem:[%s5749_s3 + $0x564] ss:$16 sps:$4 sm:$0xff]  }
 0x247   :  { %2020 = vmatprep.subr.bf16.mxu1 %v4410_v11  ;;  %2437 = vmatprep.subr.bf16.mxu0 %v4413_v12  ;;  %v4473_v11 = vld [vmem:[%s5749_s3 + $0x64c] ss:$16 sps:$4 sm:$0xff]   ;;  %v4468_v12 = vld [vmem:[%s5749_s3 + $0x560] ss:$16 sps:$4 sm:$0xff]  }
 0x24a   :  { %2021 = vmatpush1.bf16.msra.mxu1 %v4408_v15  ;;  %2438 = vmatpush1.bf16.msra.mxu0 %v4411_v16  ;;  %v4479_v15 = vld [vmem:[%s5749_s3 + $0x66c] ss:$16 sps:$4 sm:$0xff]   ;;  %v3911_v16 = vld [vmem:[%s5749_s3 + $0x5a0] sm:$0x11] }
 0x24b   :  { %3827 = vmatprep.subr.msk.bf16.mxu1 %vm336_vm2, %v3824_v17  ;;  %3897 = vmatprep.subr.msk.bf16.mxu0 %vm336_vm2, %v3894_v18  ;;  %v3980_v17 = vld [vmem:[%s5749_s3 + $0x688] sm:$0x11]  ;;  %v4474_v18 = vld [vmem:[%s5749_s3 + $0x580] ss:$16 sps:$4 sm:$0xff]   ;;  %v3926_v20 = vcombine.high %v3911_v16, %v3911_v16 }
 0x24e   :  { %2023 = vmatpush1.bf16.msra.mxu1 %v2005_v21  ;;  %2440 = vmatpush1.bf16.msra.mxu0 %v2387_v22  ;;  %v3996_v21 = vcombine.high %v3980_v17, %v3980_v17  ;;  %v3925_v22 = vcombine.low %v3911_v16, %v3911_v16 }
 0x24f   :  { %2204 = vmatprep.subr.bf16.mxu1 %v4420_v23  ;;  %2621 = vmatprep.subr.bf16.mxu0 %v4423_v24  ;;  %v3995_v23 = vcombine.low %v3980_v17, %v3980_v17  ;;  %v4519_v17 = vld [vmem:[%s5749_s3 + $0x694] ss:$16 sps:$4 sm:$0xff]  }
 0x250   :  { %v2569_v24 = vsel %vm336_vm2, %v3925_v22, 0 }
 0x251   :  { %3828 = vmatmul.mubr.msk.bf16.vlgmr.msra.gmra.mrb[40].mxu1 %vm223_vm3, %v5144_v47  ;;  %3898 = vmatmul.mubr.msk.bf16.vlgmr.msra.gmra.mrb[44].mxu0 %vm223_vm3, %v5252_v28  ;;  %v2478_v47 = vld [vmem:[#allocation2 + $0x18] sm:$0x3]  ;;  %v2951_v25 = vsel %vm336_vm2, %v3995_v23, 0 }
 0x252   :  { %2205 = vmatpush1.bf16.msra.mxu1 %v4418_v26  ;;  %2622 = vmatpush1.bf16.msra.mxu0 %v4421_v27  ;;  %v5306_v50 = vpack.c.bf16 %v2478_v47, %v2478_v47  ;;  %v4486_v26 = vld [vmem:[%s5749_s3 + $0x5b4] ss:$16 sps:$4 sm:$0xff]   ;;  %v4489_v27 = vld [vmem:[%s5749_s3 + $0x69c] ss:$16 sps:$4 sm:$0xff]   ;;  %v4499_v47 = vld [vmem:[%s5749_s3 + $0x6d8] ss:$16 sps:$4 sm:$0xff]  }
 0x253   :  { %2206 = vmatprep.subr.bf16.mxu1 %v4426_v29  ;;  %2623 = vmatprep.subr.bf16.mxu0 %v4429_v30  ;;  %v4484_v29 = vld [vmem:[%s5749_s3 + $0x5b0] ss:$16 sps:$4 sm:$0xff]   ;;  %v4487_v30 = vld [vmem:[%s5749_s3 + $0x698] ss:$16 sps:$4 sm:$0xff]  }
 0x254   :  { %2236 = vmatprep.mubr.bf16.mxu1 %v4558_v2  ;;  %2653 = vmatprep.mubr.bf16.mxu0 %v4558_v2 }
 0x256   :  { %2207 = vmatpush1.bf16.msra.mxu1 %v4424_v31  ;;  %2624 = vmatpush1.bf16.msra.mxu0 %v4427_v32  ;;  %v4492_v32 = vld [vmem:[%s5749_s3 + $0x5d4] ss:$16 sps:$4 sm:$0xff]  }
 0x257   :  { %2208 = vmatprep.subr.bf16.mxu1 %v4432_v33  ;;  %2625 = vmatprep.subr.bf16.mxu0 %v4435_v34  ;;  %v4495_v33 = vld [vmem:[%s5749_s3 + $0x6bc] ss:$16 sps:$4 sm:$0xff]   ;;  %v4490_v34 = vld [vmem:[%s5749_s3 + $0x5d0] ss:$16 sps:$4 sm:$0xff]  }
 0x25a   :  { %2209 = vmatpush1.bf16.msra.mxu1 %v4430_v37  ;;  %2626 = vmatpush1.bf16.msra.mxu0 %v4433_v38  ;;  %v4501_v37 = vld [vmem:[%s5749_s3 + $0x6dc] ss:$16 sps:$4 sm:$0xff]   ;;  %v3945_v38 = vld [vmem:[%s5749_s3 + $0x610] sm:$0x11] }
 0x25b   :  { %3861 = vmatprep.subr.msk.bf16.mxu1 %vm336_vm2, %v3858_v39  ;;  %3931 = vmatprep.subr.msk.bf16.mxu0 %vm336_vm2, %v3928_v40 }
 0x25e   :  { %2211 = vmatpush1.bf16.msra.mxu1 %v2193_v43  ;;  %2628 = vmatpush1.bf16.msra.mxu0 %v2575_v44 }
 0x25f   :  { %2392 = vmatprep.subr.bf16.mxu1 %v4442_v45  ;;  %2809 = vmatprep.subr.bf16.mxu0 %v4445_v46  ;;  %v4496_v46 = vld [vmem:[%s5749_s3 + $0x5f0] ss:$16 sps:$4 sm:$0xff]  }
 0x261   :  { %3862 = vmatmul.mubr.msk.bf16.vlgmr.msra.gmra.mrb[44].mxu1 %vm223_vm3, %v5198_v6  ;;  %3932 = vmatmul.mubr.msk.bf16.vlgmr.msra.gmra.mrb[48].mxu0 %vm223_vm3, %v5306_v50  ;;  %v2666_v6 = vld [vmem:[#allocation2 + $0x1a] sm:$0x3] }
 0x262   :  { %2393 = vmatpush1.bf16.msra.mxu1 %v4440_v48  ;;  %2810 = vmatpush1.bf16.msra.mxu0 %v4443_v49  ;;  %v5360_v9 = vpack.c.bf16 %v2666_v6, %v2666_v6  ;;  %v3960_v48 = vcombine.high %v3945_v38, %v3945_v38 }
 0x263   :  { %2394 = vmatprep.subr.bf16.mxu1 %v4448_v51  ;;  %2811 = vmatprep.subr.bf16.mxu0 %v4451_v52  ;;  %v4030_v51 = vcombine.high %v4014_v41, %v4014_v41  ;;  %v3959_v52 = vcombine.low %v3945_v38, %v3945_v38  ;;  %v3293_v38 = vld [vmem:[%s5750_s4 + $0x108] sm:$0xff] }
 0x264   :  { %2424 = vmatprep.mubr.bf16.mxu1 %v4558_v2  ;;  %2841 = vmatprep.mubr.bf16.mxu0 %v4558_v2 }
 0x266   :  { %2395 = vmatpush1.bf16.msra.mxu1 %v4446_v53  ;;  %2812 = vmatpush1.bf16.msra.mxu0 %v4449_v54  ;;  %v4029_v53 = vcombine.low %v4014_v41, %v4014_v41  ;;  %v2757_v54 = vsel %vm336_vm2, %v3959_v52, 0 }
 0x267   :  { %2396 = vmatprep.subr.bf16.mxu1 %v4454_v55  ;;  %2813 = vmatprep.subr.bf16.mxu0 %v4457_v56  ;;  %v4508_v56 = vld [vmem:[%s5749_s3 + $0x624] ss:$16 sps:$4 sm:$0xff]  }
 0x268   :  { %v3139_v55 = vsel %vm336_vm2, %v4029_v53, 0 }
 0x26a   :  { %2397 = vmatpush1.bf16.msra.mxu1 %v4452_v59  ;;  %2814 = vmatpush1.bf16.msra.mxu0 %v4455_v60  ;;  %v5466_v59 = vpack.c.bf16 %v3042_v57, %v3042_v57  ;;  %v4511_v60 = vld [vmem:[%s5749_s3 + $0x644] ss:$16 sps:$4 sm:$0xff]  }
 0x26b   :  { %3895 = vmatprep.subr.msk.bf16.mxu1 %vm336_vm2, %v3892_v61  ;;  %3965 = vmatprep.subr.msk.bf16.mxu0 %vm336_vm2, %v3962_v62  ;;  %v4509_v61 = vld [vmem:[%s5749_s3 + $0x640] ss:$16 sps:$4 sm:$0xff]   ;;  %v4514_v62 = vld [vmem:[%s5749_s3 + $0x664] ss:$16 sps:$4 sm:$0xff]  }
 0x26c   :  { %v3296_v57 = vld [vmem:[%s5750_s4 + $0x120] sm:$0xff] }
 0x26e   :  { %2399 = vmatpush1.bf16.msra.mxu1 %v2381_v1  ;;  %2816 = vmatpush1.bf16.msra.mxu0 %v2763_v3  ;;  %v3979_v1 = vld [vmem:[%s5749_s3 + $0x680] sm:$0x11] }
 0x26f   :  { %2580 = vmatprep.subr.bf16.mxu1 %v4464_v4  ;;  %2997 = vmatprep.subr.bf16.mxu0 %v4467_v5 }
 0x271   :  { %3896 = vmatmul.mubr.msk.bf16.vlgmr.msra.gmra.mrb[48].mxu1 %vm223_vm3, %v5252_v28  ;;  %3966 = vmatmul.mubr.msk.bf16.vlgmr.msra.gmra.mrb[52].mxu0 %vm223_vm3, %v5360_v9  ;;  %v2854_v28 = vld [vmem:[#allocation2 + $0x1c] sm:$0x3] }
 0x272   :  { %2581 = vmatpush1.bf16.msra.mxu1 %v4462_v7  ;;  %2998 = vmatpush1.bf16.msra.mxu0 %v4465_v8  ;;  %v5414_v31 = vpack.c.bf16 %v2854_v28, %v2854_v28 }
 0x273   :  { %2582 = vmatprep.subr.bf16.mxu1 %v4470_v10  ;;  %2999 = vmatprep.subr.bf16.mxu0 %v4473_v11 }
 0x274   :  { %2612 = vmatprep.mubr.bf16.mxu1 %v4558_v2  ;;  %3029 = vmatprep.mubr.bf16.mxu0 %v4558_v2 }
 0x276   :  { %2583 = vmatpush1.bf16.msra.mxu1 %v4468_v12  ;;  %3000 = vmatpush1.bf16.msra.mxu0 %v4471_v13  ;;  %v3994_v13 = vcombine.high %v3979_v1, %v3979_v1 }
 0x277   :  { %2584 = vmatprep.subr.bf16.mxu1 %v4476_v14  ;;  %3001 = vmatprep.subr.bf16.mxu0 %v4479_v15  ;;  %v3993_v14 = vcombine.low %v3979_v1, %v3979_v1 }
 0x279   :  { %v2945_v16 = vsel %vm336_vm2, %v3993_v14, 0 }
 0x27a   :  { %2585 = vmatpush1.bf16.msra.mxu1 %v4474_v18  ;;  %3002 = vmatpush1.bf16.msra.mxu0 %v4477_v19  ;;  %v4517_v18 = vld [vmem:[%s5749_s3 + $0x690] ss:$16 sps:$4 sm:$0xff]   ;;  %v4522_v19 = vld [vmem:[%s5749_s3 + $0x6b4] ss:$16 sps:$4 sm:$0xff]  }
 0x27b   :  { %3929 = vmatprep.subr.msk.bf16.mxu1 %vm336_vm2, %v3926_v20  ;;  %3999 = vmatprep.subr.msk.bf16.mxu0 %vm336_vm2, %v3996_v21  ;;  %v4520_v20 = vld [vmem:[%s5749_s3 + $0x6b0] ss:$16 sps:$4 sm:$0xff]   ;;  %v4525_v21 = vld [vmem:[%s5749_s3 + $0x6d4] ss:$16 sps:$4 sm:$0xff]  }
 0x27e   :  { %2587 = vmatpush1.bf16.msra.mxu1 %v2569_v24  ;;  %3004 = vmatpush1.bf16.msra.mxu0 %v2951_v25  ;;  %v4013_v24 = vld [vmem:[%s5749_s3 + $0x6f0] sm:$0x11] }
 0x27f   :  { %2768 = vmatprep.subr.bf16.mxu1 %v4486_v26  ;;  %3185 = vmatprep.subr.bf16.mxu0 %v4489_v27 }
 0x281   :  { %3930 = vmatmul.mubr.msk.bf16.vlgmr.msra.gmra.mrb[52].mxu1 %vm223_vm3, %v5306_v50  ;;  %4000 = vmatmul.mubr.msk.bf16.vlgmr.msra.gmra.mrb[56].mxu0 %vm223_vm3, %v5414_v31 }
 0x282   :  { %2769 = vmatpush1.bf16.msra.mxu1 %v4484_v29  ;;  %3186 = vmatpush1.bf16.msra.mxu0 %v4487_v30 }
 0x283   :  { %2770 = vmatprep.subr.bf16.mxu1 %v4492_v32  ;;  %3187 = vmatprep.subr.bf16.mxu0 %v4495_v33  ;;  %v4523_v32 = vld [vmem:[%s5749_s3 + $0x6d0] ss:$16 sps:$4 sm:$0xff]  }
 0x284   :  { %v5441_v39 = vpop.f32.mrb[0].mxu1  ;;  %v591_v40 = vpop.f32.mrb[4].mxu0  ;;  %2800 = vmatprep.mubr.bf16.mxu1 %v4558_v2  ;;  %3217 = vmatprep.mubr.bf16.mxu0 %v4558_v2 }
 0x285   :  { %v5448_v42 = vpop.f32.mrb[1].mxu1  ;;  %v593_v43 = vpop.f32.mrb[5].mxu0 }
 0x286   :  { %2771 = vmatpush1.bf16.msra.mxu1 %v4490_v34  ;;  %3188 = vmatpush1.bf16.msra.mxu0 %v4493_v35  ;;  %v387_v44 = vpop.f32.mrb[2].mxu1  ;;  %v595_v45 = vpop.f32.mrb[6].mxu0  ;;  %v4028_v35 = vcombine.high %v4013_v24, %v4013_v24 }
 0x287   :  { %v388_v49 = vpop.f32.mrb[3].mxu1  ;;  %v596_v50 = vpop.f32.mrb[7].mxu0  ;;  %2772 = vmatprep.subr.bf16.mxu1 %v4498_v36  ;;  %3189 = vmatprep.subr.bf16.mxu0 %v4501_v37  ;;  %v4027_v36 = vcombine.low %v4013_v24, %v4013_v24  ;;  %v3292_v37 = vld [vmem:[%s5750_s4 + $0x100] sm:$0xff]  ;;  %v3294_v44 = vld [vmem:[%s5750_s4 + $0x110] sm:$0xff]  ;;  %v3295_v45 = vld [vmem:[%s5750_s4 + $0x118] sm:$0xff] }
 0x288   :  { %v4131_v50 = vpack.c.bf16 %v3295_v45, %v3294_v44  ;;  %v3308_v24 = vld [vmem:[%s5750_s4 + $0x180] sm:$0xff]  ;;  %v3314_v45 = vld [vmem:[%s5750_s4 + $0x1b0] sm:$0xff] }
 0x289   :  { %v3133_v41 = vsel %vm336_vm2, %v4027_v36, 0 }
 0x28a   :  { %2773 = vmatpush1.bf16.msra.mxu1 %v4496_v46  ;;  %3190 = vmatpush1.bf16.msra.mxu0 %v4499_v47 }
 0x28b   :  { %3963 = vmatprep.subr.msk.bf16.mxu1 %vm336_vm2, %v3960_v48  ;;  %4033 = vmatprep.subr.msk.bf16.mxu0 %vm336_vm2, %v4030_v51 }
 0x28e   :  { %2775 = vmatpush1.bf16.msra.mxu1 %v2757_v54  ;;  %3192 = vmatpush1.bf16.msra.mxu0 %v3139_v55 }
 0x28f   :  { %2956 = vmatprep.subr.bf16.mxu1 %v4508_v56 }
 0x291   :  { %3964 = vmatmul.mubr.msk.bf16.vlgmr.msra.gmra.mrb[56].mxu1 %vm223_vm3, %v5360_v9  ;;  %4034 = vmatmul.mubr.msk.bf16.vlgmr.msra.gmra.mrb[60].mxu0 %vm223_vm3, %v5466_v59  ;;  %v4512_v9 = vld [vmem:[%s5749_s3 + $0x660] ss:$16 sps:$4 sm:$0xff]  }
 0x292   :  { %2957 = vmatpush1.bf16.msra.mxu1 %v4506_v58  ;;  %2988 = vmatprep.mubr.bf16.mxu1 %v4558_v2  ;;  %v3297_v58 = vld [vmem:[%s5750_s4 + $0x128] sm:$0xff] }
 0x293   :  { %2958 = vmatprep.subr.bf16.mxu1 %v4511_v60  ;;  %v3298_v60 = vld [vmem:[%s5750_s4 + $0x130] sm:$0xff] }
 0x294   :  { %v424_v63 = vpop.f32.mrb[4].mxu1  ;;  %v775_v0 = vpop.f32.mrb[8].mxu0 }
 0x295   :  { %v592_v3 = vadd.f32 %v591_v40, %v424_v63  ;;  %v426_v4 = vpop.f32.mrb[5].mxu1  ;;  %v777_v5 = vpop.f32.mrb[9].mxu0  ;;  %v4128_v40 = vpack.c.bf16 %v3293_v38, %v3292_v37  ;;  %v3300_v63 = vld [vmem:[%s5750_s4 + $0x140] sm:$0xff] }
 0x296   :  { %v594_v6 = vadd.f32 %v593_v43, %v426_v4  ;;  %v428_v7 = vpop.f32.mrb[6].mxu1  ;;  %v779_v8 = vpop.f32.mrb[10].mxu0  ;;  %2959 = vmatpush1.bf16.msra.mxu1 %v4509_v61  ;;  %v3299_v61 = vld [vmem:[%s5750_s4 + $0x138] sm:$0xff] }
 0x297   :  { %v784_v10 = vadd.f32 %v775_v0, %v592_v3  ;;  %v429_v11 = vpop.f32.mrb[7].mxu1  ;;  %v780_v12 = vpop.f32.mrb[11].mxu0  ;;  %2960 = vmatprep.subr.bf16.mxu1 %v4514_v62  ;;  %v4137_v62 = vpack.c.bf16 %v3299_v61, %v3298_v60  ;;  %v3301_v0 = vld [vmem:[%s5750_s4 + $0x148] sm:$0xff] }
 0x298   :  { %v785_v15 = vadd.f32 %v777_v5, %v594_v6  ;;  %v4140_v1 = vpack.c.bf16 %v3301_v0, %v3300_v63  ;;  %v3302_v5 = vld [vmem:[%s5750_s4 + $0x150] sm:$0xff]  ;;  %v3303_v6 = vld [vmem:[%s5750_s4 + $0x158] sm:$0xff] }
 0x299   :  { %v4143_v11 = vpack.c.bf16 %v3303_v6, %v3302_v5  ;;  %v4560_v6 = vmov 0.0  }
 0x29a   :  { %2961 = vmatpush1.bf16.msra.mxu1 %v4512_v9 }
 0x29b   :  { %3997 = vmatprep.subr.msk.bf16.mxu1 %vm336_vm2, %v3994_v13 }
 0x29e   :  { %2963 = vmatpush1.bf16.msra.mxu1 %v2945_v16 }
 0x29f   :  { %3144 = vmatprep.subr.bf16.mxu1 %v4519_v17 }
 0x2a1   :  { %3998 = vmatmul.mubr.msk.bf16.vlgmr.msra.gmra.mrb[60].mxu1 %vm223_vm3, %v5414_v31 }
 0x2a2   :  { %3145 = vmatpush1.bf16.msra.mxu1 %v4517_v18  ;;  %3176 = vmatprep.mubr.bf16.mxu1 %v4558_v2  ;;  %v3304_v18 = vld [vmem:[%s5750_s4 + $0x160] sm:$0xff] }
 0x2a3   :  { %3146 = vmatprep.subr.bf16.mxu1 %v4522_v19  ;;  %v3305_v19 = vld [vmem:[%s5750_s4 + $0x168] sm:$0xff] }
 0x2a4   :  { %v550_v22 = vpop.f32.mrb[8].mxu1  ;;  %v963_v23 = vpop.f32.mrb[12].mxu0 }
 0x2a5   :  { %v551_v25 = vadd.f32 %v550_v22, %v5441_v39  ;;  %v972_v26 = vadd.f32 %v963_v23, %v784_v10  ;;  %v552_v27 = vpop.f32.mrb[9].mxu1  ;;  %v965_v28 = vpop.f32.mrb[13].mxu0  ;;  %v4559_v39 = vmov 0.0|0.0   ;;  %v3307_v22 = vld [vmem:[%s5750_s4 + $0x178] sm:$0xff] }
 0x2a6   :  { %v553_v29 = vadd.f32 %v552_v27, %v5448_v42  ;;  %v973_v30 = vadd.f32 %v965_v28, %v785_v15  ;;  %v554_v2 = vpop.f32.mrb[10].mxu1  ;;  %v967_v31 = vpop.f32.mrb[14].mxu0  ;;  %3147 = vmatpush1.bf16.msra.mxu1 %v4520_v20  ;;  %4127 = vmatprep.subr.bf16.mxu0 %v4559_v39  ;;  %v4146_v20 = vpack.c.bf16 %v3305_v19, %v3304_v18 }
 0x2a7   :  { %v555_v33 = vpop.f32.mrb[11].mxu1  ;;  %v968_v34 = vpop.f32.mrb[15].mxu0  ;;  %3148 = vmatprep.subr.bf16.mxu1 %v4525_v21  ;;  %4129 = vmatpush1.bf16.msra.mxu0 %v4128_v40  ;;  %v3306_v21 = vld [vmem:[%s5750_s4 + $0x170] sm:$0xff] }
 0x2a8   :  { %4130 = vmatprep.subr.bf16.mxu0 %v4559_v39  ;;  %v4149_v23 = vpack.c.bf16 %v3307_v22, %v3306_v21 }
 0x2aa   :  { %3149 = vmatpush1.bf16.msra.mxu1 %v4523_v32 }
 0x2ab   :  { %4031 = vmatprep.subr.msk.bf16.mxu1 %vm336_vm2, %v4028_v35  ;;  %4132 = vmatpush1.bf16.msra.mxu0 %v4131_v50 }
 0x2ac   :  { %4133 = vmatprep.subr.bf16.mxu0 %v4559_v39 }
 0x2ae   :  { %3151 = vmatpush1.bf16.msra.mxu1 %v3133_v41 }
 0x2b1   :  { %4032 = vmatmul.mubr.msk.bf16.vlgmr.msra.gmra.mrb[64].mxu1 %vm223_vm3, %v5466_v59  ;;  %v4134_v59 = vpack.c.bf16 %v3297_v58, %v3296_v57 }
 0x2b3   :  { %4135 = vmatpush1.bf16.msra.mxu0 %v4134_v59 }
 0x2b4   :  { %v734_v42 = vpop.f32.mrb[12].mxu1  ;;  %v1151_v43 = vpop.f32.mrb[16].mxu0  ;;  %4136 = vmatprep.subr.bf16.mxu0 %v4559_v39 }
 0x2b5   :  { %v782_v46 = vadd.f32 %v734_v42, %v551_v25  ;;  %v1160_v47 = vadd.f32 %v1151_v43, %v972_v26  ;;  %v736_v48 = vpop.f32.mrb[13].mxu1  ;;  %v1153_v49 = vpop.f32.mrb[17].mxu0  ;;  %v3309_v25 = vld [vmem:[%s5750_s4 + $0x188] sm:$0xff]  ;;  %v3312_v42 = vld [vmem:[%s5750_s4 + $0x1a0] sm:$0xff] }
 0x2b6   :  { %v783_v51 = vadd.f32 %v736_v48, %v553_v29  ;;  %v1161_v52 = vadd.f32 %v1153_v49, %v973_v30  ;;  %v738_v53 = vpop.f32.mrb[14].mxu1  ;;  %v1155_v54 = vpop.f32.mrb[18].mxu0  ;;  %v4152_v26 = vpack.c.bf16 %v3309_v25, %v3308_v24  ;;  %v3310_v29 = vld [vmem:[%s5750_s4 + $0x190] sm:$0xff]  ;;  %v3311_v30 = vld [vmem:[%s5750_s4 + $0x198] sm:$0xff]  ;;  %v3313_v43 = vld [vmem:[%s5750_s4 + $0x1a8] sm:$0xff] }
 0x2b7   :  { %v739_v55 = vpop.f32.mrb[15].mxu1  ;;  %v1156_v56 = vpop.f32.mrb[19].mxu0  ;;  %4138 = vmatpush1.bf16.msra.mxu0 %v4137_v62  ;;  %v4155_v34 = vpack.c.bf16 %v3311_v30, %v3310_v29  ;;  %v4158_v44 = vpack.c.bf16 %v3313_v43, %v3312_v42  ;;  %v3316_v48 = vld [vmem:[%s5750_s4 + $0x1c0] sm:$0xff]  ;;  %v3317_v49 = vld [vmem:[%s5750_s4 + $0x1c8] sm:$0xff]  ;;  %v3318_v53 = vld [vmem:[%s5750_s4 + $0x1d0] sm:$0xff] }
 0x2b8   :  { %4139 = vmatprep.subr.bf16.mxu0 %v4559_v39  ;;  %v4164_v50 = vpack.c.bf16 %v3317_v49, %v3316_v48  ;;  %v3319_v54 = vld [vmem:[%s5750_s4 + $0x1d8] sm:$0xff]  ;;  %v3280_v25 = vld [vmem:[%s5750_s4 + $0xa0] sm:$0xff]  ;;  %v3285_v43 = vld [vmem:[%s5750_s4 + $0xc8] sm:$0xff] }
 0x2b9   :  { %v4167_v59 = vpack.c.bf16 %v3319_v54, %v3318_v53  ;;  %v3284_v42 = vld [vmem:[%s5750_s4 + $0xc0] sm:$0xff]  ;;  %v3286_v48 = vld [vmem:[%s5750_s4 + $0xd0] sm:$0xff]  ;;  %v3287_v49 = vld [vmem:[%s5750_s4 + $0xd8] sm:$0xff] }
 0x2ba   :  { %v3271_v53 = vld [vmem:[%s5750_s4 + $0x58] sm:$0xff] }
 0x2bb   :  { %4141 = vmatpush1.bf16.msra.mxu0 %v4140_v1 }
 0x2bc   :  { %4142 = vmatprep.subr.bf16.mxu0 %v4559_v39 }
 0x2bf   :  { %4144 = vmatpush1.bf16.msra.mxu0 %v4143_v11  ;;  %v3261_v11 = vld [vmem:[%s5750_s4 + $0x8] sm:$0xff] }
 0x2c0   :  { %4145 = vmatprep.subr.bf16.mxu0 %v4559_v39 }
 0x2c3   :  { %4147 = vmatpush1.bf16.msra.mxu0 %v4146_v20 }
 0x2c4   :  { %v922_v3 = vpop.f32.mrb[16].mxu1  ;;  %v1339_v4 = vpop.f32.mrb[20].mxu0  ;;  %4148 = vmatprep.subr.bf16.mxu0 %v4559_v39 }
 0x2c5   :  { %v970_v7 = vadd.f32 %v922_v3, %v782_v46  ;;  %v1348_v8 = vadd.f32 %v1339_v4, %v1160_v47  ;;  %v924_v9 = vpop.f32.mrb[17].mxu1  ;;  %v1341_v10 = vpop.f32.mrb[21].mxu0  ;;  %v3315_v46 = vld [vmem:[%s5750_s4 + $0x1b8] sm:$0xff]  ;;  %v3320_v3 = vld [vmem:[%s5750_s4 + $0x1e0] sm:$0xff]  ;;  %v3321_v4 = vld [vmem:[%s5750_s4 + $0x1e8] sm:$0xff] }
 0x2c6   :  { %v971_v12 = vadd.f32 %v924_v9, %v783_v51  ;;  %v1349_v13 = vadd.f32 %v1341_v10, %v1161_v52  ;;  %v926_v14 = vpop.f32.mrb[18].mxu1  ;;  %v1343_v15 = vpop.f32.mrb[22].mxu0  ;;  %v4161_v47 = vpack.c.bf16 %v3315_v46, %v3314_v45  ;;  %v4170_v5 = vpack.c.bf16 %v3321_v4, %v3320_v3  ;;  %v3260_v10 = vld [vmem:[%s5750_s4] sm:$0xff] }
 0x2c7   :  { %v927_v16 = vpop.f32.mrb[19].mxu1  ;;  %v1344_v17 = vpop.f32.mrb[23].mxu0  ;;  %4150 = vmatpush1.bf16.msra.mxu0 %v4149_v23  ;;  %v3279_v14 = vld [vmem:[%s5750_s4 + $0x98] sm:$0xff]  ;;  %v3262_v15 = vld [vmem:[%s5750_s4 + $0x10] sm:$0xff]  ;;  %v4111_v45 = vpack.c.bf16 %v3285_v43, %v3284_v42  ;;  %v3268_v46 = vld [vmem:[%s5750_s4 + $0x40] sm:$0xff] }
 0x2c8   :  { %4151 = vmatprep.subr.bf16.mxu0 %v4559_v39  ;;  %v3263_v16 = vld [vmem:[%s5750_s4 + $0x18] sm:$0xff] }
 0x2c9   :  { %v4101_v18 = vpack.c.bf16 %v3263_v16, %v3262_v15 }
 0x2cb   :  { %4153 = vmatpush1.bf16.msra.mxu0 %v4152_v26  ;;  %v3281_v26 = vld [vmem:[%s5750_s4 + $0xa8] sm:$0xff] }
 0x2cc   :  { %4154 = vmatprep.subr.bf16.mxu0 %v4559_v39 }
 0x2cf   :  { %4156 = vmatpush1.bf16.msra.mxu0 %v4155_v34 }
 0x2d0   :  { %4157 = vmatprep.subr.bf16.mxu0 %v4559_v39 }
 0x2d3   :  { %4159 = vmatpush1.bf16.msra.mxu0 %v4158_v44 }
 0x2d4   :  { %v1110_v27 = vpop.f32.mrb[20].mxu1  ;;  %v1527_v28 = vpop.f32.mrb[24].mxu0  ;;  %4160 = vmatprep.subr.bf16.mxu0 %v4559_v39 }
 0x2d5   :  { %v1158_v2 = vadd.f32 %v1110_v27, %v970_v7  ;;  %v1536_v31 = vadd.f32 %v1527_v28, %v1348_v8  ;;  %v1112_v32 = vpop.f32.mrb[21].mxu1  ;;  %v1529_v33 = vpop.f32.mrb[25].mxu0  ;;  %v3322_v7 = vld [vmem:[%s5750_s4 + $0x1f0] sm:$0xf]  ;;  %v3277_v8 = vld [vmem:[%s5750_s4 + $0x88] sm:$0xff] }
 0x2d6   :  { %v1159_v35 = vadd.f32 %v1112_v32, %v971_v12  ;;  %v1537_v36 = vadd.f32 %v1529_v33, %v1349_v13  ;;  %v1114_v37 = vpop.f32.mrb[22].mxu1  ;;  %v1531_v38 = vpop.f32.mrb[26].mxu0  ;;  %v3278_v12 = vld [vmem:[%s5750_s4 + $0x90] sm:$0xff]  ;;  %v4097_v13 = vpack.c.bf16 %v3261_v11, %v3260_v10  ;;  %v3265_v32 = vld [vmem:[%s5750_s4 + $0x28] sm:$0xff]  ;;  %v3291_v10 = vld [vmem:[%s5750_s4 + $0xf8] sm:$0xff] }
 0x2d7   :  { %v1115_v40 = vpop.f32.mrb[23].mxu1  ;;  %v1532_v41 = vpop.f32.mrb[27].mxu0  ;;  %4162 = vmatpush1.bf16.msra.mxu0 %v4161_v47  ;;  %v4099_v17 = vpack.c.bf16 %v3279_v14, %v3278_v12  ;;  %v3283_v37 = vld [vmem:[%s5750_s4 + $0xb8] sm:$0xff]  ;;  %v3266_v38 = vld [vmem:[%s5750_s4 + $0x30] sm:$0xff]  ;;  %v3269_v47 = vld [vmem:[%s5750_s4 + $0x48] sm:$0xff] }
 0x2d8   :  { %4163 = vmatprep.subr.bf16.mxu0 %v4559_v39  ;;  %v3267_v41 = vld [vmem:[%s5750_s4 + $0x38] sm:$0xff]  ;;  %v3274_v12 = vld [vmem:[%s5750_s4 + $0x70] sm:$0xff] }
 0x2d9   :  { %v4109_v44 = vpack.c.bf16 %v3267_v41, %v3266_v38 }
 0x2db   :  { %4165 = vmatpush1.bf16.msra.mxu0 %v4164_v50  ;;  %v4113_v50 = vpack.c.bf16 %v3269_v47, %v3268_v46 }
 0x2dc   :  { %4166 = vmatprep.subr.bf16.mxu0 %v4559_v39 }
 0x2df   :  { %4168 = vmatpush1.bf16.msra.mxu0 %v4167_v59 }
 0x2e0   :  { %4169 = vmatprep.subr.bf16.mxu0 %v4559_v39  ;;  %v3276_v39 = vld [vmem:[%s5750_s4 + $0x80] sm:$0xff] }
 0x2e1   :  { %v4095_v9 = vpack.c.bf16 %v3277_v8, %v3276_v39 }
 0x2e3   :  { %4171 = vmatpush1.bf16.msra.mxu0 %v4170_v5  ;;  %4096 = vmatprep.subr.bf16.mxu1 %v4095_v9  ;;  %v3272_v5 = vld [vmem:[%s5750_s4 + $0x60] sm:$0xff]  ;;  %v3290_v9 = vld [vmem:[%s5750_s4 + $0xf0] sm:$0xff] }
 0x2e4   :  { %v1298_v51 = vpop.f32.mrb[24].mxu1  ;;  %v1715_v52 = vpop.f32.mrb[28].mxu0  ;;  %3460 = vmatprep.subr.mxu0 %v4560_v6  ;;  %4098 = vmatpush3.bf16.msra.mxu1 %v4097_v13  ;;  %v3273_v6 = vld [vmem:[%s5750_s4 + $0x68] sm:$0xff]  ;;  %v4123_v11 = vpack.c.bf16 %v3291_v10, %v3290_v9  ;;  %v3275_v13 = vld [vmem:[%s5750_s4 + $0x78] sm:$0xff] }
 0x2e5   :  { %v1346_v55 = vadd.f32 %v1298_v51, %v1158_v2  ;;  %v1724_v56 = vadd.f32 %v1715_v52, %v1536_v31  ;;  %v1300_v57 = vpop.f32.mrb[25].mxu1  ;;  %v1717_v58 = vpop.f32.mrb[29].mxu0  ;;  %4100 = vmatprep.subr.bf16.mxu1 %v4099_v17  ;;  %v4103_v2 = vpack.c.bf16 %v3281_v26, %v3280_v25  ;;  %v3264_v31 = vld [vmem:[%s5750_s4 + $0x20] sm:$0xff]  ;;  %v4115_v51 = vpack.c.bf16 %v3287_v49, %v3286_v48  ;;  %v3270_v52 = vld [vmem:[%s5750_s4 + $0x50] sm:$0xff] }
 0x2e6   :  { %v1347_v60 = vadd.f32 %v1300_v57, %v1159_v35  ;;  %v1725_v61 = vadd.f32 %v1717_v58, %v1537_v36  ;;  %v1302_v62 = vpop.f32.mrb[26].mxu1  ;;  %v1719_v63 = vpop.f32.mrb[30].mxu0  ;;  %v4105_v35 = vpack.c.bf16 %v3265_v32, %v3264_v31  ;;  %v3282_v36 = vld [vmem:[%s5750_s4 + $0xb0] sm:$0xff]  ;;  %v4117_v54 = vpack.c.bf16 %v3271_v53, %v3270_v52 }
 0x2e7   :  { %v1303_v0 = vpop.f32.mrb[27].mxu1  ;;  %v1720_v1 = vpop.f32.mrb[31].mxu0  ;;  %4035 = vmatpush1.msk.msra.mxu0 %vm130_vm0, %v3322_v7  ;;  %v4107_v40 = vpack.c.bf16 %v3283_v37, %v3282_v36  ;;  %v3289_v62 = vld [vmem:[%s5750_s4 + $0xe8] sm:$0xff]  ;;  %v4121_v8 = vpack.c.bf16 %v3273_v6, %v3272_v5  ;;  %v4125_v14 = vpack.c.bf16 %v3275_v13, %v3274_v12 }
 0x2e8   :  { %4102 = vmatpush3.bf16.msra.mxu1 %v4101_v18 }
 0x2e9   :  { %4104 = vmatprep.subr.bf16.mxu1 %v4103_v2 }
 0x2ec   :  { %4106 = vmatpush3.bf16.msra.mxu1 %v4105_v35 }
 0x2ed   :  { %4108 = vmatprep.subr.bf16.mxu1 %v4107_v40 }
 0x2f0   :  { %4110 = vmatpush3.bf16.msra.mxu1 %v4109_v44 }
 0x2f1   :  { %4112 = vmatprep.subr.bf16.mxu1 %v4111_v45 }
 0x2f4   :  { %v1486_v19 = vpop.f32.mrb[28].mxu1  ;;  %v1903_v20 = vpop.f32.mrb[32].mxu0  ;;  %4114 = vmatpush3.bf16.msra.mxu1 %v4113_v50 }
 0x2f5   :  { %v1534_v21 = vadd.f32 %v1486_v19, %v1346_v55  ;;  %v1912_v22 = vadd.f32 %v1903_v20, %v1724_v56  ;;  %v1488_v23 = vpop.f32.mrb[29].mxu1  ;;  %v1905_v24 = vpop.f32.mrb[33].mxu0  ;;  %4116 = vmatprep.subr.bf16.mxu1 %v4115_v51 }
 0x2f6   :  { %v1535_v27 = vadd.f32 %v1488_v23, %v1347_v60  ;;  %v1913_v28 = vadd.f32 %v1905_v24, %v1725_v61  ;;  %v1490_v29 = vpop.f32.mrb[30].mxu1  ;;  %v1907_v30 = vpop.f32.mrb[34].mxu0  ;;  %v3288_v61 = vld [vmem:[%s5750_s4 + $0xe0] sm:$0xff] }
 0x2f7   :  { %v1491_v33 = vpop.f32.mrb[31].mxu1  ;;  %v1908_v34 = vpop.f32.mrb[35].mxu0  ;;  %v4119_v4 = vpack.c.bf16 %v3289_v62, %v3288_v61 }
 0x2f8   :  { %4118 = vmatpush3.bf16.msra.mxu1 %v4117_v54 }
 0x2f9   :  { %4120 = vmatprep.subr.bf16.mxu1 %v4119_v4 }
 0x2fc   :  { %4122 = vmatpush3.bf16.msra.mxu1 %v4121_v8 }
 0x2fd   :  { %4124 = vmatprep.subr.bf16.mxu1 %v4123_v11  ;;  %v3231_v11 = vlaneseq }
 0x2ff   :  { %v3232_v12 = vshrl.u32 %v3231_v11, 7 }
 0x300   :  { %4126 = vmatpush3.bf16.msra.mxu1 %v4125_v14  ;;  %v3504_v14 = vld [vmem:[%s5747_s1 + $0x5] ss:$8 sm:$0xf] }
 0x301   :  { %v3241_v13 = vsub.s32 2, %v3232_v12 }
 0x304   :  { %v1674_v55 = vpop.f32.mrb[32].mxu1  ;;  %v2091_v56 = vpop.f32.mrb[36].mxu0 }
 0x305   :  { %v1722_v57 = vadd.f32 %v1674_v55, %v1534_v21  ;;  %v2100_v58 = vadd.f32 %v2091_v56, %v1912_v22  ;;  %v1676_v59 = vpop.f32.mrb[33].mxu1  ;;  %v2093_v60 = vpop.f32.mrb[37].mxu0 }
 0x306   :  { %v1723_v63 = vadd.f32 %v1676_v59, %v1535_v27  ;;  %v2101_v0 = vadd.f32 %v2093_v60, %v1913_v28  ;;  %v1678_v1 = vpop.f32.mrb[34].mxu1  ;;  %v2095_v3 = vpop.f32.mrb[38].mxu0 }
 0x307   :  { %v1679_v7 = vpop.f32.mrb[35].mxu1  ;;  %v2096_v39 = vpop.f32.mrb[39].mxu0 }
 0x314   :  { %v1862_v15 = vpop.f32.mrb[36].mxu1  ;;  %v2279_v16 = vpop.f32.mrb[40].mxu0 }
 0x315   :  { %v1910_v17 = vadd.f32 %v1862_v15, %v1722_v57  ;;  %v2288_v18 = vadd.f32 %v2279_v16, %v2100_v58  ;;  %v1864_v19 = vpop.f32.mrb[37].mxu1  ;;  %v2281_v20 = vpop.f32.mrb[41].mxu0  ;;  %v3245_v15 = vsub.s32 3, %v3232_v12  ;;  %v3242_v16 = vrot.slane %v3504_v14, %v3241_v13 }
 0x316   :  { %v1911_v21 = vadd.f32 %v1864_v19, %v1723_v63  ;;  %v2289_v22 = vadd.f32 %v2281_v20, %v2101_v0  ;;  %v1866_v23 = vpop.f32.mrb[38].mxu1  ;;  %v2283_v24 = vpop.f32.mrb[42].mxu0 }
 0x317   :  { %v1867_v25 = vpop.f32.mrb[39].mxu1  ;;  %v2284_v26 = vpop.f32.mrb[43].mxu0  ;;  %v3246_v19 = vrot.slane %v3504_v14, %v3245_v15 }
 0x324   :  { %v2050_v27 = vpop.f32.mrb[40].mxu1  ;;  %v2467_v28 = vpop.f32.mrb[44].mxu0 }
 0x325   :  { %v2098_v29 = vadd.f32 %v2050_v27, %v1910_v17  ;;  %v2476_v30 = vadd.f32 %v2467_v28, %v2288_v18  ;;  %v2052_v2 = vpop.f32.mrb[41].mxu1  ;;  %v2469_v31 = vpop.f32.mrb[45].mxu0 }
 0x326   :  { %v2099_v32 = vadd.f32 %v2052_v2, %v1911_v21  ;;  %v2477_v33 = vadd.f32 %v2469_v31, %v2289_v22  ;;  %v2054_v34 = vpop.f32.mrb[42].mxu1  ;;  %v2471_v35 = vpop.f32.mrb[46].mxu0 }
 0x327   :  { %v2055_v36 = vpop.f32.mrb[43].mxu1  ;;  %v2472_v37 = vpop.f32.mrb[47].mxu0 }
 0x334   :  { %v2238_v38 = vpop.f32.mrb[44].mxu1  ;;  %v2655_v40 = vpop.f32.mrb[48].mxu0 }
 0x335   :  { %v2286_v41 = vadd.f32 %v2238_v38, %v2098_v29  ;;  %v2664_v42 = vadd.f32 %v2655_v40, %v2476_v30  ;;  %v2240_v43 = vpop.f32.mrb[45].mxu1  ;;  %v2657_v44 = vpop.f32.mrb[49].mxu0  ;;  %v3233_v40 = vsub.s32 0, %v3232_v12 }
 0x336   :  { %v2287_v45 = vadd.f32 %v2240_v43, %v2099_v32  ;;  %v2665_v46 = vadd.f32 %v2657_v44, %v2477_v33  ;;  %v2242_v47 = vpop.f32.mrb[46].mxu1  ;;  %v2659_v48 = vpop.f32.mrb[50].mxu0 }
 0x337   :  { %v2243_v49 = vpop.f32.mrb[47].mxu1  ;;  %v2660_v50 = vpop.f32.mrb[51].mxu0 }
 0x344   :  { %v2426_v51 = vpop.f32.mrb[48].mxu1  ;;  %v2843_v52 = vpop.f32.mrb[52].mxu0 }
 0x345   :  { %v2474_v53 = vadd.f32 %v2426_v51, %v2286_v41  ;;  %v2852_v54 = vadd.f32 %v2843_v52, %v2664_v42  ;;  %v2428_v55 = vpop.f32.mrb[49].mxu1  ;;  %v2845_v56 = vpop.f32.mrb[53].mxu0  ;;  %v3237_v41 = vsub.s32 1, %v3232_v12  ;;  %v3234_v42 = vrot.slane %v3504_v14, %v3233_v40 }
 0x346   :  { %v2475_v57 = vadd.f32 %v2428_v55, %v2287_v45  ;;  %v2853_v58 = vadd.f32 %v2845_v56, %v2665_v46  ;;  %v2430_v59 = vpop.f32.mrb[50].mxu1  ;;  %v2847_v60 = vpop.f32.mrb[54].mxu0 }
 0x347   :  { %v2431_v61 = vpop.f32.mrb[51].mxu1  ;;  %v2848_v62 = vpop.f32.mrb[55].mxu0  ;;  %v3238_v44 = vrot.slane %v3504_v14, %v3237_v41 }
 0x354   :  { %v2614_v63 = vpop.f32.mrb[52].mxu1  ;;  %v3031_v0 = vpop.f32.mrb[56].mxu0 }
 0x355   :  { %v2662_v1 = vadd.f32 %v2614_v63, %v2474_v53  ;;  %v3040_v3 = vadd.f32 %v3031_v0, %v2852_v54  ;;  %v2616_v4 = vpop.f32.mrb[53].mxu1  ;;  %v3033_v5 = vpop.f32.mrb[57].mxu0 }
 0x356   :  { %v2663_v6 = vadd.f32 %v2616_v4, %v2475_v57  ;;  %v3041_v7 = vadd.f32 %v3033_v5, %v2853_v58  ;;  %v2618_v39 = vpop.f32.mrb[54].mxu1  ;;  %v3035_v8 = vpop.f32.mrb[58].mxu0  ;;  %v3259_v57 = vld [vmem:[%s5747_s1 + $0x6] ss:$0 sm:$0xff]  ;;  %s4561_s1 = smov [#allocation3]  }
 0x357   :  { %v2619_v9 = vpop.f32.mrb[55].mxu1  ;;  %v3036_v10 = vpop.f32.mrb[59].mxu0  ;;  %s3491_s24 = sshll.u32 %s4561_s1, 4  ;;  %s3492_s24 = int_to_ptr.vmem [resolvable:$true] %s3491_s24 }
 0x358   :  { %s4534_s25 = scalar_lea.vmem %s3492_s24, 32  ;;  %p4539_p1 = scmp.lt.s32.totalorder %s3492_s24, %s3492_s24 }
 0x359   :  { %p4535_p0 = scmp.ne.s32.totalorder %s3492_s24, %s4534_s25  ;;  %p4540_p2 = scmp.lt.s32.totalorder %s4534_s25, %s4534_s25 }
 0x35b   :  { %p4541_p3 = por %p4540_p2, %p4539_p1 }
 0x35d   :  { %p4542_p4 = pnand %p4541_p3, %p4535_p0 }
 0x364   :  { %v2802_v17 = vpop.f32.mrb[56].mxu1  ;;  %v3219_v18 = vpop.f32.mrb[60].mxu0 }
 0x365   :  { %v2850_v20 = vadd.f32 %v2802_v17, %v2662_v1  ;;  %v3228_v21 = vadd.f32 %v3219_v18, %v3040_v3  ;;  %v2804_v22 = vpop.f32.mrb[57].mxu1  ;;  %v3221_v23 = vpop.f32.mrb[61].mxu0 }
 0x366   :  { %v2851_v24 = vadd.f32 %v2804_v22, %v2663_v6  ;;  %v3229_v25 = vadd.f32 %v3221_v23, %v3041_v7  ;;  %v2806_v26 = vpop.f32.mrb[58].mxu1  ;;  %v3223_v27 = vpop.f32.mrb[62].mxu0 }
 0x367   :  { %v3253_v28 = vadd.f32 %v3242_v16, %v3228_v21  ;;  %v2807_v29 = vpop.f32.mrb[59].mxu1  ;;  %v3224_v30 = vpop.f32.mrb[63].mxu0 }
 0x368   :  { %v3254_v2 = vadd.f32 %v3246_v19, %v3229_v25 }
 0x369   :  { %v3257_v32 = vmax.f32 %v3253_v28, 0.0 }
 0x36a   :  { %v3258_v31 = vmax.f32 %v3254_v2, 0.0 }
 0x36c   :  { %4036 = vmatprep.mubr.msk.f32.mxu0 %vm3323_vm4, %v3258_v31 }
 0x36d   :  { %3465 = vmatmul.mubr.f32.vlgmr.msra.gmra.mrb[64].mxu0 %v3257_v32 }
 0x374   :  { %v2990_v33 = vpop.f32.mrb[60].mxu1 }
 0x375   :  { %v3038_v34 = vadd.f32 %v2990_v33, %v2850_v20  ;;  %v2992_v35 = vpop.f32.mrb[61].mxu1 }
 0x376   :  { %v3039_v36 = vadd.f32 %v2992_v35, %v2851_v24  ;;  %v2994_v37 = vpop.f32.mrb[62].mxu1 }
 0x377   :  { %v2995_v38 = vpop.f32.mrb[63].mxu1 }
 0x384   :  { %v3178_v43 = vpop.f32.mrb[64].mxu1 }
 0x385   :  { %v3226_v45 = vadd.f32 %v3178_v43, %v3038_v34  ;;  %v3180_v46 = vpop.f32.mrb[65].mxu1 }
 0x386   :  { %v3227_v47 = vadd.f32 %v3180_v46, %v3039_v36  ;;  %v3182_v48 = vpop.f32.mrb[66].mxu1 }
 0x387   :  { %v3251_v49 = vadd.f32 %v3234_v42, %v3226_v45  ;;  %v3183_v50 = vpop.f32.mrb[67].mxu1 }
 0x388   :  { %v3252_v51 = vadd.f32 %v3238_v44, %v3227_v47 }
 0x389   :  { %v3255_v53 = vmax.f32 %v3251_v49, 0.0 }
 0x38a   :  { %v3256_v52 = vmax.f32 %v3252_v51, 0.0 }
 0x38c   :  { %3394 = vmatprep.mubr.f32.mxu1 %v3256_v52 }
 0x38d   :  { %3395 = vmatmul.mubr.f32.vlgmr.msra.gmra.mrb[68].mxu1 %v3255_v53 }
 0x440   :  { %v3466_v54 = vpop.f32.mrb[64].mxu0 }
 0x441   :  { %v3468_v55 = vpop.f32.mrb[65].mxu0 }
 0x460   :  { %v4076_v56 = vpop.f32.mrb[68].mxu1 }
 0x461   :  { %v4077_v58 = vpop.f32.mrb[69].mxu1 }
 0x462   :  { %v4078_v59 = vadd.f32 %v4077_v58, %v4076_v56 }
 0x464   :  { %v3397_v60 = vadd.f32 %v4078_v59, %v3259_v57 }
 0x466   :  { %v3467_v61 = vadd.f32 %v3466_v54, %v3397_v60 }
 0x468   :  { %v3471_v62 = vsel %vm3470_vm5, %v3467_v61, -inf }
 0x469   :  { %3472 = vmax.xlane.f32.xlu0 %v3471_v62 }
 0x4f6   :  { %v3473_v63 = vpop.xlane.xlu0 %3472 }
 0x4f7   :  { %v3474_v0 = vsub.f32 %v3467_v61, %v3473_v63 }
 0x4f9   :  { %v3475_v1 = vmul.f32 1.442695, %v3474_v0 }
 0x4fb   :  { %4530 = vpow2.f32 %v3475_v1 }
 0x505   :  { %v4531_v3 = vpop.eup %4530 }
 0x506   :  { %v3477_v4 = vsel %vm3470_vm5, %v4531_v3, 0.0 }
 0x507   :  { %3478 = vadd.xlane.f32.xlu1 %v3477_v4 }
 0x594   :  { %v3479_v5 = vpop.xlane.xlu1 %3478 }
 0x595   :  { %4532 = vlog2.f32 %v3479_v5 }
 0x59f   :  { %v4533_v6 = vpop.eup %4532 }
 0x5a0   :  { %v3481_v7 = vmul.f32 0.6931472, %v4533_v6 }
 0x5a2   :  { %v3482_v39 = vadd.f32 %v3481_v7, %v3473_v63 }
 0x5a4   :  { %v3483_v8 = vsub.f32 %v3467_v61, %v3482_v39 }
 0x5a6   :  { %3484 = vst.msk [vmem:[#allocation3] sm:$0x3] %vm3470_vm5, %v3483_v8 }
 0x5a7   :  { %4545 = shalt.err (!%p4542_p4)
}
 0x5a8   :  { %s4546_s28 = scalar_lea.hbm %s5751_s5, 32 }
 0x5a9   :  { %p4547_p5 = scmp.ne.s32.totalorder %s5751_s5, %s4546_s28  ;;  %p4550_p6 = scmp.lt.u32.totalorder %s4546_s28, %s5751_s5 }
 0x5ab   :  { %p4552_p7 = pnand %p4550_p6, %p4547_p5 }
 0x5ad   :  { %4555 = shalt.err (!%p4552_p7)
}
 0x5ae   :  { %3494 = dma.vmem_to_hbm [thread:$0]  %s3492_s24, 32, %s5751_s5, [#allocation4]  }
 0x5af   :  { %4556 = dma.done.wait [#allocation4], 32  }
 0x5b0   :  { %4557 = vsyncadd [#allocation4], 4294967264 }
 0x5b1   :  { %3498 = vsyncpa [#allocation4], 1 }

</bundles_post_ra>
